<compile_context>
chip_gen: v6e
topology: v6e:2x2x1
jax: 0.10.0
libtpu: 0.0.40
codegen_flags: <defaults>
</compile_context>

<pallas_src>
import functools

import jax
import jax.numpy as jnp
from jax.experimental import pallas as pl
from jax.experimental.pallas import tpu as pltpu  # noqa: F401  (kept for TPU-specific tuning hooks)


# ----------------------------------------------------------------------------- helpers

def _fs(shape):
    """Full-array BlockSpec (whole operand resident in VMEM, grid=(1,))."""
    return pl.BlockSpec(shape, lambda i: (0,) * len(shape))


def _ln(x, g, b, eps):
    # torch.nn.LayerNorm over last dim (biased variance), math in f32.
    m = jnp.mean(x, axis=-1, keepdims=True)
    v = jnp.mean((x - m) ** 2, axis=-1, keepdims=True)
    return (x - m) * jax.lax.rsqrt(v + eps) * g + b


# ----------------------------------------------------------------------------- kernels

def _embed_qkv_kernel(x_ref, pe_ref, wemb_ref, bemb_ref, wqkv_ref, bqkv_ref,
                      x2_ref, qkv_ref):
    # embedding linear + positional encoding add, then fused QKV projection of layer 0
    emb = (jnp.dot(x_ref[...], wemb_ref[...], preferred_element_type=jnp.float32)
           + bemb_ref[...] + pe_ref[...])
    x2_ref[...] = emb
    qkv_ref[...] = (jnp.dot(emb, wqkv_ref[...], preferred_element_type=jnp.float32)
                    + bqkv_ref[...])


def _attn_kernel(q_ref, k_ref, v_ref, o_ref):
    # all B*H head groups in one shot; scale already folded into Q weights
    q = q_ref[...]                                   # [G, W, dh]
    k = k_ref[...]
    v = v_ref[...]
    s = jnp.einsum("gqd,gkd->gqk", q, k, preferred_element_type=jnp.float32)
    s = s - jnp.max(s, axis=-1, keepdims=True)       # numerically-stable softmax
    p = jnp.exp(s)
    p = p / jnp.sum(p, axis=-1, keepdims=True)
    o_ref[...] = jnp.einsum("gqk,gkd->gqd", p, v, preferred_element_type=jnp.float32)


def _encoder_tail(ctx, res, wo, bo, g1, bt1, w1, b1, w2, b2, g2, bt2, eps):
    # out-proj + residual + LN1, then FFN (fc1+ReLU+fc2) + residual + LN2
    proj = jnp.dot(ctx, wo, preferred_element_type=jnp.float32) + bo
    h = _ln(proj + res, g1, bt1, eps)
    f = jnp.maximum(jnp.dot(h, w1, preferred_element_type=jnp.float32) + b1, 0.0)
    f = jnp.dot(f, w2, preferred_element_type=jnp.float32) + b2
    return _ln(f + h, g2, bt2, eps)


def _post_kernel(ctx_ref, res_ref, wo_ref, bo_ref, g1_ref, bt1_ref,
                 w1_ref, b1_ref, w2_ref, b2_ref, g2_ref, bt2_ref, y_ref, *, eps):
    y_ref[...] = _encoder_tail(
        ctx_ref[...], res_ref[...], wo_ref[...], bo_ref[...], g1_ref[...], bt1_ref[...],
        w1_ref[...], b1_ref[...], w2_ref[...], b2_ref[...], g2_ref[...], bt2_ref[...], eps)


def _post_qkv_kernel(ctx_ref, res_ref, wo_ref, bo_ref, g1_ref, bt1_ref,
                     w1_ref, b1_ref, w2_ref, b2_ref, g2_ref, bt2_ref,
                     wqkvn_ref, bqkvn_ref, y_ref, qkv_ref, *, eps):
    y = _encoder_tail(
        ctx_ref[...], res_ref[...], wo_ref[...], bo_ref[...], g1_ref[...], bt1_ref[...],
        w1_ref[...], b1_ref[...], w2_ref[...], b2_ref[...], g2_ref[...], bt2_ref[...], eps)
    y_ref[...] = y
    # fused QKV projection for the NEXT encoder layer (saves one launch + HBM trip)
    qkv_ref[...] = (jnp.dot(y, wqkvn_ref[...], preferred_element_type=jnp.float32)
                    + bqkvn_ref[...])


def _head_kernel(y_ref, w1_ref, b1_ref, w2_ref, b2_ref, o_ref):
    h = jnp.maximum(
        jnp.dot(y_ref[...], w1_ref[...], preferred_element_type=jnp.float32) + b1_ref[...],
        0.0)
    o_ref[...] = jnp.dot(h, w2_ref[...], preferred_element_type=jnp.float32) + b2_ref[...]


# ----------------------------------------------------------------------------- pallas_call wrappers

def embed_qkv(x2, pe2, wemb, bemb, wqkv, bqkv):
    M, I = x2.shape
    E = wemb.shape[1]
    QN = wqkv.shape[1]
    args = (x2, pe2, wemb, bemb.reshape(1, E), wqkv, bqkv.reshape(1, QN))
    return pl.pallas_call(
        _embed_qkv_kernel,
        out_shape=(jax.ShapeDtypeStruct((M, E), jnp.float32),
                   jax.ShapeDtypeStruct((M, QN), jnp.float32)),
        grid=(1,),
        in_specs=[_fs(a.shape) for a in args],
        out_specs=(_fs((M, E)), _fs((M, QN))),
    )(*args)


def attention_all_heads(q3, k3, v3):
    G, L, D = q3.shape
    spec = _fs((G, L, D))
    return pl.pallas_call(
        _attn_kernel,
        out_shape=jax.ShapeDtypeStruct((G, L, D), jnp.float32),
        grid=(1,),
        in_specs=[spec, spec, spec],
        out_specs=_fs((G, L, D)),
    )(q3, k3, v3)


def _post_args(ctx2, res2, lp):
    M, E = ctx2.shape
    Hd = lp["w1"].shape[1]
    return (ctx2, res2,
            lp["wo"], lp["bo"].reshape(1, E),
            lp["ln1_g"].reshape(1, E), lp["ln1_b"].reshape(1, E),
            lp["w1"], lp["b1"].reshape(1, Hd),
            lp["w2"], lp["b2"].reshape(1, E),
            lp["ln2_g"].reshape(1, E), lp["ln2_b"].reshape(1, E))


def encoder_post(ctx2, res2, lp, eps=1e-5):
    M, E = ctx2.shape
    args = _post_args(ctx2, res2, lp)
    return pl.pallas_call(
        functools.partial(_post_kernel, eps=eps),
        out_shape=jax.ShapeDtypeStruct((M, E), jnp.float32),
        grid=(1,),
        in_specs=[_fs(a.shape) for a in args],
        out_specs=_fs((M, E)),
    )(*args)


def encoder_post_qkv(ctx2, res2, lp, wqkv_next, bqkv_next, eps=1e-5):
    M, E = ctx2.shape
    QN = wqkv_next.shape[1]
    args = _post_args(ctx2, res2, lp) + (wqkv_next, bqkv_next.reshape(1, QN))
    return pl.pallas_call(
        functools.partial(_post_qkv_kernel, eps=eps),
        out_shape=(jax.ShapeDtypeStruct((M, E), jnp.float32),
                   jax.ShapeDtypeStruct((M, QN), jnp.float32)),
        grid=(1,),
        in_specs=[_fs(a.shape) for a in args],
        out_specs=(_fs((M, E)), _fs((M, QN))),
    )(*args)


def head_fc(flat, w1, b1, w2p, b2p):
    Bn, F = flat.shape
    Hh = w1.shape[1]
    OP = w2p.shape[1]           # padded (multiple of 128) output width
    return pl.pallas_call(
        _head_kernel,
        out_shape=jax.ShapeDtypeStruct((Bn, OP), jnp.float32),
        grid=(1,),
        in_specs=[_fs((Bn, F)), _fs((F, Hh)), _fs((1, Hh)), _fs((Hh, OP)), _fs((1, OP))],
        out_specs=_fs((Bn, OP)),
    )(flat, w1, b1.reshape(1, Hh), w2p, b2p.reshape(1, OP))


# ----------------------------------------------------------------------------- params

def _init_linear(key, fan_in, fan_out):
    # mimics torch.nn.Linear default init (uniform +/- 1/sqrt(fan_in)),
    # weight stored transposed as [in, out]
    kw, kb = jax.random.split(key)
    bound = 1.0 / (fan_in ** 0.5)
    w = jax.random.uniform(kw, (fan_in, fan_out), jnp.float32, -bound, bound)
    b = jax.random.uniform(kb, (fan_out,), jnp.float32, -bound, bound)
    return w, b


def make_positional_encoding(seq_len, embed):
    pos = jnp.arange(seq_len, dtype=jnp.float32)[:, None]
    i = jnp.arange(embed)[None, :]
    denom = jnp.power(10000.0, (i // 2 * 2.0) / embed).astype(jnp.float32)
    angle = pos / denom
    pe = jnp.where(i % 2 == 0, jnp.sin(angle), jnp.cos(angle))
    return pe.astype(jnp.float32)


def init_params(key, cfg):
    keys = jax.random.split(key, 2 + cfg["num_encoder"])
    params = {}
    params["fc_embedding"] = _init_linear(keys[0], cfg["input_size"], cfg["embedding"])
    params["pe"] = make_positional_encoding(cfg["window_size"], cfg["embedding"])

    encoders = []
    E, H = cfg["embedding"], cfg["hidden"]
    for li in range(cfg["num_encoder"]):
        ks = jax.random.split(keys[2 + li], 6)
        enc = {
            "fc_Q": _init_linear(ks[0], E, E),
            "fc_K": _init_linear(ks[1], E, E),
            "fc_V": _init_linear(ks[2], E, E),
            "fc": _init_linear(ks[3], E, E),
            "ln1_g": jnp.ones((E,), jnp.float32),
            "ln1_b": jnp.zeros((E,), jnp.float32),
            "fc1": _init_linear(ks[4], E, H),
            "fc2": _init_linear(ks[5], H, E),
            "ln2_g": jnp.ones((E,), jnp.float32),
            "ln2_b": jnp.zeros((E,), jnp.float32),
        }
        encoders.append(enc)
    params["encoders"] = encoders

    klast = jax.random.split(keys[1], 2)
    params["last_fc1"] = _init_linear(klast[0], E * cfg["window_size"], H)
    params["last_fc2"] = _init_linear(klast[1], H, cfg["output_size"])
    return params


def prepare_fused_params(params, cfg, batch):
    """Kernel-side parameter prep: QKV concat, scale folding, PE tiling, output padding."""
    E = cfg["embedding"]
    dh = E // cfg["num_head"]
    scale = float(dh) ** (-0.5)

    fp = {
        "wemb": params["fc_embedding"][0],
        "bemb": params["fc_embedding"][1],
        "pe2": jnp.tile(params["pe"], (batch, 1)),          # [B*W, E]
    }

    layers = []
    for enc in params["encoders"]:
        wq, bq = enc["fc_Q"]
        wk, bk = enc["fc_K"]
        wv, bv = enc["fc_V"]
        # fold 1/sqrt(dh) attention scale into Q projection
        wqkv = jnp.concatenate([wq * scale, wk, wv], axis=1)  # [E, 3E]
        bqkv = jnp.concatenate([bq * scale, bk, bv], axis=0)  # [3E]
        layers.append(dict(
            wqkv=wqkv, bqkv=bqkv,
            wo=enc["fc"][0], bo=enc["fc"][1],
            ln1_g=enc["ln1_g"], ln1_b=enc["ln1_b"],
            w1=enc["fc1"][0], b1=enc["fc1"][1],
            w2=enc["fc2"][0], b2=enc["fc2"][1],
            ln2_g=enc["ln2_g"], ln2_b=enc["ln2_b"]))
    fp["layers"] = layers

    # head: pad narrow output to a 128-lane multiple for an unmasked store
    w1h, b1h = params["last_fc1"]
    w2h, b2h = params["last_fc2"]
    O = w2h.shape[1]
    OP = ((O + 127) // 128) * 128
    fp["w1h"], fp["b1h"] = w1h, b1h
    fp["w2h"] = jnp.pad(w2h, ((0, 0), (0, OP - O)))
    fp["b2h"] = jnp.pad(b2h, (0, OP - O))
    return fp


# ----------------------------------------------------------------------------- forward

def transformer_forward(params, x, cfg):
    B, W, I = x.shape
    E = cfg["embedding"]
    H = cfg["num_head"]
    dh = E // H
    G = B * H

    fp = prepare_fused_params(params, cfg, B)
    layers = fp["layers"]
    n_layers = len(layers)

    # embedding + positional encoding + layer-0 QKV (one launch)
    x2 = x.reshape(B * W, I)
    out2, qkv = embed_qkv(x2, fp["pe2"], fp["wemb"], fp["bemb"],
                          layers[0]["wqkv"], layers[0]["bqkv"])

    for li in range(n_layers):
        lp = layers[li]
        # PyTorch-faithful head split: raw contiguous .view(B*H, -1, dh)
        # (NOT a standard per-head transpose; matches the source model exactly).
        q3 = qkv[:, 0 * E:1 * E].reshape(G, W, dh)
        k3 = qkv[:, 1 * E:2 * E].reshape(G, W, dh)
        v3 = qkv[:, 2 * E:3 * E].reshape(G, W, dh)

        ctx2 = attention_all_heads(q3, k3, v3).reshape(B * W, E)

        if li + 1 < n_layers:
            nxt = layers[li + 1]
            out2, qkv = encoder_post_qkv(ctx2, out2, lp, nxt["wqkv"], nxt["bqkv"])
        else:
            out2 = encoder_post(ctx2, out2, lp)

    flat = out2.reshape(B, W * E)
    y_pad = head_fc(flat, fp["w1h"], fp["b1h"], fp["w2h"], fp["b2h"])
    return y_pad[:, :cfg["output_size"]]


# ----------------------------------------------------------------------------- reference (pure JAX)

def transformer_reference(params, x, cfg):
    B, W, I = x.shape
    E, H = cfg["embedding"], cfg["num_head"]
    dh = E // H

    def lin(x2d, wb, relu=False):
        w, b = wb
        y = x2d @ w + b
        return jnp.maximum(y, 0.0) if relu else y

    def ln(x2d, g, b, eps=1e-5):
        m = jnp.mean(x2d, -1, keepdims=True)
        v = jnp.mean((x2d - m) ** 2, -1, keepdims=True)
        return (x2d - m) / jnp.sqrt(v + eps) * g + b

    emb = lin(x.reshape(B * W, I), params["fc_embedding"]).reshape(B, W, E)
    out = emb + params["pe"][None]
    for enc in params["encoders"]:
        x2 = out.reshape(B * W, E)
        Q = lin(x2, enc["fc_Q"]).reshape(B * H, W, dh)
        K = lin(x2, enc["fc_K"]).reshape(B * H, W, dh)
        V = lin(x2, enc["fc_V"]).reshape(B * H, W, dh)
        att = jax.nn.softmax(jnp.einsum("gqd,gkd->gqk", Q, K) * dh ** -0.5, -1)
        ctx = jnp.einsum("gqk,gkd->gqd", att, V).reshape(B * W, E)
        mha = ln(lin(ctx, enc["fc"]) + x2, enc["ln1_g"], enc["ln1_b"])
        ff = lin(lin(mha, enc["fc1"], relu=True), enc["fc2"])
        out = ln(ff + mha, enc["ln2_g"], enc["ln2_b"]).reshape(B, W, E)
    flat = out.reshape(B, W * E)
    return lin(lin(flat, params["last_fc1"], relu=True), params["last_fc2"])


# ----------------------------------------------------------------------------- main

if __name__ == "__main__":
    cfg = dict(
        input_size=4,
        embedding=32,
        window_size=8,
        num_head=4,
        hidden=64,
        num_encoder=2,
        output_size=5,
        dropout=0.0,
    )
    B = 2

    key = jax.random.PRNGKey(0)
    kx, kp = jax.random.split(key)
    x = jax.random.normal(kx, (B, cfg["window_size"], cfg["input_size"]), jnp.float32)
    params = init_params(kp, cfg)

    fwd = jax.jit(functools.partial(transformer_forward, cfg=cfg))
    y = jax.block_until_ready(fwd(params, x))

    y_ref = transformer_reference(params, x, cfg)
    assert y.shape == (B, cfg["output_size"])
    assert jnp.allclose(y, y_ref, rtol=1e-4, atol=1e-4), "mismatch vs pure-JAX reference"

    print("KERNEL_OK")
</pallas_src>

<mosaic_0001>
module attributes {stable_mosaic.version = 11 : i64} {
  func.func @_embed_qkv_kernel(%arg0: i32, %arg1: memref<16x4xf32, #tpu.memory_space<vmem>>, %arg2: memref<16x32xf32, #tpu.memory_space<vmem>>, %arg3: memref<4x32xf32, #tpu.memory_space<vmem>>, %arg4: memref<1x32xf32, #tpu.memory_space<vmem>>, %arg5: memref<32x96xf32, #tpu.memory_space<vmem>>, %arg6: memref<1x96xf32, #tpu.memory_space<vmem>>, %arg7: memref<16x32xf32, #tpu.memory_space<vmem>>, %arg8: memref<16x96xf32, #tpu.memory_space<vmem>>) attributes {dimension_semantics = [#tpu.dimension_semantics<arbitrary>], iteration_bounds = array<i64: 1>, scalar_prefetch = 0 : i64, scratch_operands = 0 : i64, tpu.core_type = #tpu.core_type<tc>, window_params = [{pipeline_mode = #tpu.pipeline_mode<synchronous>, transform_indices = @transform_0, window_bounds = array<i64: 16, 4>}, {pipeline_mode = #tpu.pipeline_mode<synchronous>, transform_indices = @transform_1, window_bounds = array<i64: 16, 32>}, {pipeline_mode = #tpu.pipeline_mode<synchronous>, transform_indices = @transform_2, window_bounds = array<i64: 4, 32>}, {pipeline_mode = #tpu.pipeline_mode<synchronous>, transform_indices = @transform_3, window_bounds = array<i64: 1, 32>}, {pipeline_mode = #tpu.pipeline_mode<synchronous>, transform_indices = @transform_4, window_bounds = array<i64: 32, 96>}, {pipeline_mode = #tpu.pipeline_mode<synchronous>, transform_indices = @transform_5, window_bounds = array<i64: 1, 96>}, {pipeline_mode = #tpu.pipeline_mode<synchronous>, transform_indices = @transform_6, window_bounds = array<i64: 16, 32>}, {pipeline_mode = #tpu.pipeline_mode<synchronous>, transform_indices = @transform_7, window_bounds = array<i64: 16, 96>}]} {
    %c0 = arith.constant 0 : index
    %c0_0 = arith.constant 0 : index
    %0 = vector.load %arg1[%c0, %c0_0] : memref<16x4xf32, #tpu.memory_space<vmem>>, vector<16x4xf32>
    %c0_1 = arith.constant 0 : index
    %c0_2 = arith.constant 0 : index
    %1 = vector.load %arg3[%c0_1, %c0_2] : memref<4x32xf32, #tpu.memory_space<vmem>>, vector<4x32xf32>
    %cst = arith.constant dense<0.000000e+00> : vector<16x32xf32>
    %2 = tpu.matmul %0, %1, %cst {dimension_numbers = #tpu.dot_dimension_numbers<[1], [0], [0], [1], [0, 0, 1, 1], [], []>} : vector<16x4xf32>, vector<4x32xf32>, vector<16x32xf32> -> vector<16x32xf32>
    %c0_3 = arith.constant 0 : index
    %c0_4 = arith.constant 0 : index
    %3 = vector.load %arg4[%c0_3, %c0_4] : memref<1x32xf32, #tpu.memory_space<vmem>>, vector<1x32xf32>
    %4 = vector.broadcast %3 : vector<1x32xf32> to vector<16x32xf32>
    %5 = arith.addf %2, %4 : vector<16x32xf32>
    %c0_5 = arith.constant 0 : index
    %c0_6 = arith.constant 0 : index
    %6 = vector.load %arg2[%c0_5, %c0_6] : memref<16x32xf32, #tpu.memory_space<vmem>>, vector<16x32xf32>
    %7 = arith.addf %5, %6 : vector<16x32xf32>
    %c0_7 = arith.constant 0 : index
    %c0_8 = arith.constant 0 : index
    %8 = vector.load %arg7[%c0_7, %c0_8] : memref<16x32xf32, #tpu.memory_space<vmem>>, vector<16x32xf32>
    tpu.vector_store %arg7[%c0_7, %c0_8], %7 {strides = array<i32>} : memref<16x32xf32, #tpu.memory_space<vmem>>, vector<16x32xf32>,
    %c0_9 = arith.constant 0 : index
    %c0_10 = arith.constant 0 : index
    %9 = vector.load %arg5[%c0_9, %c0_10] : memref<32x96xf32, #tpu.memory_space<vmem>>, vector<32x96xf32>
    %cst_11 = arith.constant dense<0.000000e+00> : vector<16x96xf32>
    %10 = tpu.matmul %7, %9, %cst_11 {dimension_numbers = #tpu.dot_dimension_numbers<[1], [0], [0], [1], [0, 0, 1, 1], [], []>} : vector<16x32xf32>, vector<32x96xf32>, vector<16x96xf32> -> vector<16x96xf32>
    %c0_12 = arith.constant 0 : index
    %c0_13 = arith.constant 0 : index
    %11 = vector.load %arg6[%c0_12, %c0_13] : memref<1x96xf32, #tpu.memory_space<vmem>>, vector<1x96xf32>
    %12 = vector.broadcast %11 : vector<1x96xf32> to vector<16x96xf32>
    %13 = arith.addf %10, %12 : vector<16x96xf32>
    %c0_14 = arith.constant 0 : index
    %c0_15 = arith.constant 0 : index
    %14 = vector.load %arg8[%c0_14, %c0_15] : memref<16x96xf32, #tpu.memory_space<vmem>>, vector<16x96xf32>
    tpu.vector_store %arg8[%c0_14, %c0_15], %13 {strides = array<i32>} : memref<16x96xf32, #tpu.memory_space<vmem>>, vector<16x96xf32>,
    return
  }
  func.func @transform_0(%arg0: i32) -> (i32, i32) {
    %c0_i32 = arith.constant 0 : i32
    %c0_i32_0 = arith.constant 0 : i32
    %c0_i32_1 = arith.constant 0 : i32
    return %c0_i32, %c0_i32_0 : i32, i32
  }
  func.func @transform_1(%arg0: i32) -> (i32, i32) {
    %c0_i32 = arith.constant 0 : i32
    %c0_i32_0 = arith.constant 0 : i32
    %c0_i32_1 = arith.constant 0 : i32
    return %c0_i32, %c0_i32_0 : i32, i32
  }
  func.func @transform_2(%arg0: i32) -> (i32, i32) {
    %c0_i32 = arith.constant 0 : i32
    %c0_i32_0 = arith.constant 0 : i32
    %c0_i32_1 = arith.constant 0 : i32
    return %c0_i32, %c0_i32_0 : i32, i32
  }
  func.func @transform_3(%arg0: i32) -> (i32, i32) {
    %c0_i32 = arith.constant 0 : i32
    %c0_i32_0 = arith.constant 0 : i32
    %c0_i32_1 = arith.constant 0 : i32
    return %c0_i32, %c0_i32_0 : i32, i32
  }
  func.func @transform_4(%arg0: i32) -> (i32, i32) {
    %c0_i32 = arith.constant 0 : i32
    %c0_i32_0 = arith.constant 0 : i32
    %c0_i32_1 = arith.constant 0 : i32
    return %c0_i32, %c0_i32_0 : i32, i32
  }
  func.func @transform_5(%arg0: i32) -> (i32, i32) {
    %c0_i32 = arith.constant 0 : i32
    %c0_i32_0 = arith.constant 0 : i32
    %c0_i32_1 = arith.constant 0 : i32
    return %c0_i32, %c0_i32_0 : i32, i32
  }
  func.func @transform_6(%arg0: i32) -> (i32, i32) {
    %c0_i32 = arith.constant 0 : i32
    %c0_i32_0 = arith.constant 0 : i32
    %c0_i32_1 = arith.constant 0 : i32
    return %c0_i32, %c0_i32_0 : i32, i32
  }
  func.func @transform_7(%arg0: i32) -> (i32, i32) {
    %c0_i32 = arith.constant 0 : i32
    %c0_i32_0 = arith.constant 0 : i32
    %c0_i32_1 = arith.constant 0 : i32
    return %c0_i32, %c0_i32_0 : i32, i32
  }
}

module attributes {stable_mosaic.version = 11 : i64} {
  func.func @_attn_kernel(%arg0: i32, %arg1: memref<8x8x8xf32, #tpu.memory_space<vmem>>, %arg2: memref<8x8x8xf32, #tpu.memory_space<vmem>>, %arg3: memref<8x8x8xf32, #tpu.memory_space<vmem>>, %arg4: memref<8x8x8xf32, #tpu.memory_space<vmem>>) attributes {dimension_semantics = [#tpu.dimension_semantics<arbitrary>], iteration_bounds = array<i64: 1>, scalar_prefetch = 0 : i64, scratch_operands = 0 : i64, tpu.core_type = #tpu.core_type<tc>, window_params = [{pipeline_mode = #tpu.pipeline_mode<synchronous>, transform_indices = @transform_0, window_bounds = array<i64: 8, 8, 8>}, {pipeline_mode = #tpu.pipeline_mode<synchronous>, transform_indices = @transform_1, window_bounds = array<i64: 8, 8, 8>}, {pipeline_mode = #tpu.pipeline_mode<synchronous>, transform_indices = @transform_2, window_bounds = array<i64: 8, 8, 8>}, {pipeline_mode = #tpu.pipeline_mode<synchronous>, transform_indices = @transform_3, window_bounds = array<i64: 8, 8, 8>}]} {
    %c0 = arith.constant 0 : index
    %c0_0 = arith.constant 0 : index
    %c0_1 = arith.constant 0 : index
    %0 = vector.load %arg1[%c0, %c0_0, %c0_1] : memref<8x8x8xf32, #tpu.memory_space<vmem>>, vector<8x8x8xf32>
    %c0_2 = arith.constant 0 : index
    %c0_3 = arith.constant 0 : index
    %c0_4 = arith.constant 0 : index
    %1 = vector.load %arg2[%c0_2, %c0_3, %c0_4] : memref<8x8x8xf32, #tpu.memory_space<vmem>>, vector<8x8x8xf32>
    %c0_5 = arith.constant 0 : index
    %c0_6 = arith.constant 0 : index
    %c0_7 = arith.constant 0 : index
    %2 = vector.load %arg3[%c0_5, %c0_6, %c0_7] : memref<8x8x8xf32, #tpu.memory_space<vmem>>, vector<8x8x8xf32>
    "tpu.trace_start"() <{level = 10 : i32, message = "gqd,gkd->gqk"}> : () -> ()
    %cst = arith.constant dense<0.000000e+00> : vector<8x8x8xf32>
    %3 = tpu.matmul %0, %1, %cst {dimension_numbers = #tpu.dot_dimension_numbers<[2], [2], [1], [1], [0, 0, 0, 1, 1, 1], [0], [0]>} : vector<8x8x8xf32>, vector<8x8x8xf32>, vector<8x8x8xf32> -> vector<8x8x8xf32>
    "tpu.trace_stop"() : () -> ()
    %cst_8 = arith.constant dense<0xFF800000> : vector<8x8xf32>
    %4 = vector.multi_reduction <maximumf>, %3, %cst_8 [2] : vector<8x8x8xf32> to vector<8x8xf32>
    %5 = vector.shape_cast %4 : vector<8x8xf32> to vector<8x8x1xf32>
    %6 = vector.broadcast %5 : vector<8x8x1xf32> to vector<8x8x8xf32>
    %7 = arith.subf %3, %6 : vector<8x8x8xf32>
    %8 = math.exp %7 : vector<8x8x8xf32>
    %cst_9 = arith.constant dense<0.000000e+00> : vector<8x8xf32>
    %9 = vector.multi_reduction <add>, %8, %cst_9 [2] : vector<8x8x8xf32> to vector<8x8xf32>
    %10 = vector.shape_cast %9 : vector<8x8xf32> to vector<8x8x1xf32>
    %11 = vector.broadcast %10 : vector<8x8x1xf32> to vector<8x8x8xf32>
    %12 = arith.divf %8, %11 : vector<8x8x8xf32>
    "tpu.trace_start"() <{level = 10 : i32, message = "gqk,gkd->gqd"}> : () -> ()
    %cst_10 = arith.constant dense<0.000000e+00> : vector<8x8x8xf32>
    %13 = tpu.matmul %12, %2, %cst_10 {dimension_numbers = #tpu.dot_dimension_numbers<[2], [1], [1], [2], [0, 0, 0, 1, 1, 2], [0], [0]>} : vector<8x8x8xf32>, vector<8x8x8xf32>, vector<8x8x8xf32> -> vector<8x8x8xf32>
    "tpu.trace_stop"() : () -> ()
    %c0_11 = arith.constant 0 : index
    %c0_12 = arith.constant 0 : index
    %c0_13 = arith.constant 0 : index
    %14 = vector.load %arg4[%c0_11, %c0_12, %c0_13] : memref<8x8x8xf32, #tpu.memory_space<vmem>>, vector<8x8x8xf32>
    tpu.vector_store %arg4[%c0_11, %c0_12, %c0_13], %13 {strides = array<i32>} : memref<8x8x8xf32, #tpu.memory_space<vmem>>, vector<8x8x8xf32>,
    return
  }
  func.func @transform_0(%arg0: i32) -> (i32, i32, i32) {
    %c0_i32 = arith.constant 0 : i32
    %c0_i32_0 = arith.constant 0 : i32
    %c0_i32_1 = arith.constant 0 : i32
    %c0_i32_2 = arith.constant 0 : i32
    return %c0_i32, %c0_i32_0, %c0_i32_1 : i32, i32, i32
  }
  func.func @transform_1(%arg0: i32) -> (i32, i32, i32) {
    %c0_i32 = arith.constant 0 : i32
    %c0_i32_0 = arith.constant 0 : i32
    %c0_i32_1 = arith.constant 0 : i32
    %c0_i32_2 = arith.constant 0 : i32
    return %c0_i32, %c0_i32_0, %c0_i32_1 : i32, i32, i32
  }
  func.func @transform_2(%arg0: i32) -> (i32, i32, i32) {
    %c0_i32 = arith.constant 0 : i32
    %c0_i32_0 = arith.constant 0 : i32
    %c0_i32_1 = arith.constant 0 : i32
    %c0_i32_2 = arith.constant 0 : i32
    return %c0_i32, %c0_i32_0, %c0_i32_1 : i32, i32, i32
  }
  func.func @transform_3(%arg0: i32) -> (i32, i32, i32) {
    %c0_i32 = arith.constant 0 : i32
    %c0_i32_0 = arith.constant 0 : i32
    %c0_i32_1 = arith.constant 0 : i32
    %c0_i32_2 = arith.constant 0 : i32
    return %c0_i32, %c0_i32_0, %c0_i32_1 : i32, i32, i32
  }
}

module attributes {stable_mosaic.version = 11 : i64} {
  func.func @_post_qkv_kernel(%arg0: i32, %arg1: memref<16x32xf32, #tpu.memory_space<vmem>>, %arg2: memref<16x32xf32, #tpu.memory_space<vmem>>, %arg3: memref<32x32xf32, #tpu.memory_space<vmem>>, %arg4: memref<1x32xf32, #tpu.memory_space<vmem>>, %arg5: memref<1x32xf32, #tpu.memory_space<vmem>>, %arg6: memref<1x32xf32, #tpu.memory_space<vmem>>, %arg7: memref<32x64xf32, #tpu.memory_space<vmem>>, %arg8: memref<1x64xf32, #tpu.memory_space<vmem>>, %arg9: memref<64x32xf32, #tpu.memory_space<vmem>>, %arg10: memref<1x32xf32, #tpu.memory_space<vmem>>, %arg11: memref<1x32xf32, #tpu.memory_space<vmem>>, %arg12: memref<1x32xf32, #tpu.memory_space<vmem>>, %arg13: memref<32x96xf32, #tpu.memory_space<vmem>>, %arg14: memref<1x96xf32, #tpu.memory_space<vmem>>, %arg15: memref<16x32xf32, #tpu.memory_space<vmem>>, %arg16: memref<16x96xf32, #tpu.memory_space<vmem>>) attributes {dimension_semantics = [#tpu.dimension_semantics<arbitrary>], iteration_bounds = array<i64: 1>, scalar_prefetch = 0 : i64, scratch_operands = 0 : i64, tpu.core_type = #tpu.core_type<tc>, window_params = [{pipeline_mode = #tpu.pipeline_mode<synchronous>, transform_indices = @transform_0, window_bounds = array<i64: 16, 32>}, {pipeline_mode = #tpu.pipeline_mode<synchronous>, transform_indices = @transform_1, window_bounds = array<i64: 16, 32>}, {pipeline_mode = #tpu.pipeline_mode<synchronous>, transform_indices = @transform_2, window_bounds = array<i64: 32, 32>}, {pipeline_mode = #tpu.pipeline_mode<synchronous>, transform_indices = @transform_3, window_bounds = array<i64: 1, 32>}, {pipeline_mode = #tpu.pipeline_mode<synchronous>, transform_indices = @transform_4, window_bounds = array<i64: 1, 32>}, {pipeline_mode = #tpu.pipeline_mode<synchronous>, transform_indices = @transform_5, window_bounds = array<i64: 1, 32>}, {pipeline_mode = #tpu.pipeline_mode<synchronous>, transform_indices = @transform_6, window_bounds = array<i64: 32, 64>}, {pipeline_mode = #tpu.pipeline_mode<synchronous>, transform_indices = @transform_7, window_bounds = array<i64: 1, 64>}, {pipeline_mode = #tpu.pipeline_mode<synchronous>, transform_indices = @transform_8, window_bounds = array<i64: 64, 32>}, {pipeline_mode = #tpu.pipeline_mode<synchronous>, transform_indices = @transform_9, window_bounds = array<i64: 1, 32>}, {pipeline_mode = #tpu.pipeline_mode<synchronous>, transform_indices = @transform_10, window_bounds = array<i64: 1, 32>}, {pipeline_mode = #tpu.pipeline_mode<synchronous>, transform_indices = @transform_11, window_bounds = array<i64: 1, 32>}, {pipeline_mode = #tpu.pipeline_mode<synchronous>, transform_indices = @transform_12, window_bounds = array<i64: 32, 96>}, {pipeline_mode = #tpu.pipeline_mode<synchronous>, transform_indices = @transform_13, window_bounds = array<i64: 1, 96>}, {pipeline_mode = #tpu.pipeline_mode<synchronous>, transform_indices = @transform_14, window_bounds = array<i64: 16, 32>}, {pipeline_mode = #tpu.pipeline_mode<synchronous>, transform_indices = @transform_15, window_bounds = array<i64: 16, 96>}]} {
    %c0 = arith.constant 0 : index
    %c0_0 = arith.constant 0 : index
    %0 = vector.load %arg1[%c0, %c0_0] : memref<16x32xf32, #tpu.memory_space<vmem>>, vector<16x32xf32>
    %c0_1 = arith.constant 0 : index
    %c0_2 = arith.constant 0 : index
    %1 = vector.load %arg2[%c0_1, %c0_2] : memref<16x32xf32, #tpu.memory_space<vmem>>, vector<16x32xf32>
    %c0_3 = arith.constant 0 : index
    %c0_4 = arith.constant 0 : index
    %2 = vector.load %arg3[%c0_3, %c0_4] : memref<32x32xf32, #tpu.memory_space<vmem>>, vector<32x32xf32>
    %c0_5 = arith.constant 0 : index
    %c0_6 = arith.constant 0 : index
    %3 = vector.load %arg4[%c0_5, %c0_6] : memref<1x32xf32, #tpu.memory_space<vmem>>, vector<1x32xf32>
    %c0_7 = arith.constant 0 : index
    %c0_8 = arith.constant 0 : index
    %4 = vector.load %arg5[%c0_7, %c0_8] : memref<1x32xf32, #tpu.memory_space<vmem>>, vector<1x32xf32>
    %c0_9 = arith.constant 0 : index
    %c0_10 = arith.constant 0 : index
    %5 = vector.load %arg6[%c0_9, %c0_10] : memref<1x32xf32, #tpu.memory_space<vmem>>, vector<1x32xf32>
    %c0_11 = arith.constant 0 : index
    %c0_12 = arith.constant 0 : index
    %6 = vector.load %arg7[%c0_11, %c0_12] : memref<32x64xf32, #tpu.memory_space<vmem>>, vector<32x64xf32>
    %c0_13 = arith.constant 0 : index
    %c0_14 = arith.constant 0 : index
    %7 = vector.load %arg8[%c0_13, %c0_14] : memref<1x64xf32, #tpu.memory_space<vmem>>, vector<1x64xf32>
    %c0_15 = arith.constant 0 : index
    %c0_16 = arith.constant 0 : index
    %8 = vector.load %arg9[%c0_15, %c0_16] : memref<64x32xf32, #tpu.memory_space<vmem>>, vector<64x32xf32>
    %c0_17 = arith.constant 0 : index
    %c0_18 = arith.constant 0 : index
    %9 = vector.load %arg10[%c0_17, %c0_18] : memref<1x32xf32, #tpu.memory_space<vmem>>, vector<1x32xf32>
    %c0_19 = arith.constant 0 : index
    %c0_20 = arith.constant 0 : index
    %10 = vector.load %arg11[%c0_19, %c0_20] : memref<1x32xf32, #tpu.memory_space<vmem>>, vector<1x32xf32>
    %c0_21 = arith.constant 0 : index
    %c0_22 = arith.constant 0 : index
    %11 = vector.load %arg12[%c0_21, %c0_22] : memref<1x32xf32, #tpu.memory_space<vmem>>, vector<1x32xf32>
    %cst = arith.constant dense<0.000000e+00> : vector<16x32xf32>
    %12 = tpu.matmul %0, %2, %cst {dimension_numbers = #tpu.dot_dimension_numbers<[1], [0], [0], [1], [0, 0, 1, 1], [], []>} : vector<16x32xf32>, vector<32x32xf32>, vector<16x32xf32> -> vector<16x32xf32>
    %13 = vector.broadcast %3 : vector<1x32xf32> to vector<16x32xf32>
    %14 = arith.addf %12, %13 : vector<16x32xf32>
    %15 = arith.addf %14, %1 : vector<16x32xf32>
    %cst_23 = arith.constant dense<0.000000e+00> : vector<16xf32>
    %16 = vector.multi_reduction <add>, %15, %cst_23 [1] : vector<16x32xf32> to vector<16xf32>
    %17 = vector.shape_cast %16 : vector<16xf32> to vector<16x1xf32>
    %cst_24 = arith.constant 3.200000e+01 : f32
    %18 = vector.broadcast %cst_24 : f32 to vector<16x1xf32>
    %19 = arith.divf %17, %18 : vector<16x1xf32>
    %20 = vector.broadcast %19 : vector<16x1xf32> to vector<16x32xf32>
    %21 = arith.subf %15, %20 : vector<16x32xf32>
    %22 = arith.mulf %21, %21 : vector<16x32xf32>
    %cst_25 = arith.constant dense<0.000000e+00> : vector<16xf32>
    %23 = vector.multi_reduction <add>, %22, %cst_25 [1] : vector<16x32xf32> to vector<16xf32>
    %24 = vector.shape_cast %23 : vector<16xf32> to vector<16x1xf32>
    %cst_26 = arith.constant 3.200000e+01 : f32
    %25 = vector.broadcast %cst_26 : f32 to vector<16x1xf32>
    %26 = arith.divf %24, %25 : vector<16x1xf32>
    %27 = vector.broadcast %19 : vector<16x1xf32> to vector<16x32xf32>
    %28 = arith.subf %15, %27 : vector<16x32xf32>
    %cst_27 = arith.constant 9.99999974E-6 : f32
    %29 = vector.broadcast %cst_27 : f32 to vector<16x1xf32>
    %30 = arith.addf %26, %29 : vector<16x1xf32>
    %31 = math.rsqrt %30 : vector<16x1xf32>
    %32 = vector.broadcast %31 : vector<16x1xf32> to vector<16x32xf32>
    %33 = arith.mulf %28, %32 : vector<16x32xf32>
    %34 = vector.broadcast %4 : vector<1x32xf32> to vector<16x32xf32>
    %35 = arith.mulf %33, %34 : vector<16x32xf32>
    %36 = vector.broadcast %5 : vector<1x32xf32> to vector<16x32xf32>
    %37 = arith.addf %35, %36 : vector<16x32xf32>
    %cst_28 = arith.constant dense<0.000000e+00> : vector<16x64xf32>
    %38 = tpu.matmul %37, %6, %cst_28 {dimension_numbers = #tpu.dot_dimension_numbers<[1], [0], [0], [1], [0, 0, 1, 1], [], []>} : vector<16x32xf32>, vector<32x64xf32>, vector<16x64xf32> -> vector<16x64xf32>
    %39 = vector.broadcast %7 : vector<1x64xf32> to vector<16x64xf32>
    %40 = arith.addf %38, %39 : vector<16x64xf32>
    %cst_29 = arith.constant 0.000000e+00 : f32
    %41 = vector.broadcast %cst_29 : f32 to vector<16x64xf32>
    %42 = arith.maximumf %40, %41 : vector<16x64xf32>
    %cst_30 = arith.constant dense<0.000000e+00> : vector<16x32xf32>
    %43 = tpu.matmul %42, %8, %cst_30 {dimension_numbers = #tpu.dot_dimension_numbers<[1], [0], [0], [1], [0, 0, 1, 1], [], []>} : vector<16x64xf32>, vector<64x32xf32>, vector<16x32xf32> -> vector<16x32xf32>
    %44 = vector.broadcast %9 : vector<1x32xf32> to vector<16x32xf32>
    %45 = arith.addf %43, %44 : vector<16x32xf32>
    %46 = arith.addf %45, %37 : vector<16x32xf32>
    %cst_31 = arith.constant dense<0.000000e+00> : vector<16xf32>
    %47 = vector.multi_reduction <add>, %46, %cst_31 [1] : vector<16x32xf32> to vector<16xf32>
    %48 = vector.shape_cast %47 : vector<16xf32> to vector<16x1xf32>
    %cst_32 = arith.constant 3.200000e+01 : f32
    %49 = vector.broadcast %cst_32 : f32 to vector<16x1xf32>
    %50 = arith.divf %48, %49 : vector<16x1xf32>
    %51 = vector.broadcast %50 : vector<16x1xf32> to vector<16x32xf32>
    %52 = arith.subf %46, %51 : vector<16x32xf32>
    %53 = arith.mulf %52, %52 : vector<16x32xf32>
    %cst_33 = arith.constant dense<0.000000e+00> : vector<16xf32>
    %54 = vector.multi_reduction <add>, %53, %cst_33 [1] : vector<16x32xf32> to vector<16xf32>
    %55 = vector.shape_cast %54 : vector<16xf32> to vector<16x1xf32>
    %cst_34 = arith.constant 3.200000e+01 : f32
    %56 = vector.broadcast %cst_34 : f32 to vector<16x1xf32>
    %57 = arith.divf %55, %56 : vector<16x1xf32>
    %58 = vector.broadcast %50 : vector<16x1xf32> to vector<16x32xf32>
    %59 = arith.subf %46, %58 : vector<16x32xf32>
    %cst_35 = arith.constant 9.99999974E-6 : f32
    %60 = vector.broadcast %cst_35 : f32 to vector<16x1xf32>
    %61 = arith.addf %57, %60 : vector<16x1xf32>
    %62 = math.rsqrt %61 : vector<16x1xf32>
    %63 = vector.broadcast %62 : vector<16x1xf32> to vector<16x32xf32>
    %64 = arith.mulf %59, %63 : vector<16x32xf32>
    %65 = vector.broadcast %10 : vector<1x32xf32> to vector<16x32xf32>
    %66 = arith.mulf %64, %65 : vector<16x32xf32>
    %67 = vector.broadcast %11 : vector<1x32xf32> to vector<16x32xf32>
    %68 = arith.addf %66, %67 : vector<16x32xf32>
    %c0_36 = arith.constant 0 : index
    %c0_37 = arith.constant 0 : index
    %69 = vector.load %arg15[%c0_36, %c0_37] : memref<16x32xf32, #tpu.memory_space<vmem>>, vector<16x32xf32>
    tpu.vector_store %arg15[%c0_36, %c0_37], %68 {strides = array<i32>} : memref<16x32xf32, #tpu.memory_space<vmem>>, vector<16x32xf32>,
    %c0_38 = arith.constant 0 : index
    %c0_39 = arith.constant 0 : index
    %70 = vector.load %arg13[%c0_38, %c0_39] : memref<32x96xf32, #tpu.memory_space<vmem>>, vector<32x96xf32>
    %cst_40 = arith.constant dense<0.000000e+00> : vector<16x96xf32>
    %71 = tpu.matmul %68, %70, %cst_40 {dimension_numbers = #tpu.dot_dimension_numbers<[1], [0], [0], [1], [0, 0, 1, 1], [], []>} : vector<16x32xf32>, vector<32x96xf32>, vector<16x96xf32> -> vector<16x96xf32>
    %c0_41 = arith.constant 0 : index
    %c0_42 = arith.constant 0 : index
    %72 = vector.load %arg14[%c0_41, %c0_42] : memref<1x96xf32, #tpu.memory_space<vmem>>, vector<1x96xf32>
    %73 = vector.broadcast %72 : vector<1x96xf32> to vector<16x96xf32>
    %74 = arith.addf %71, %73 : vector<16x96xf32>
    %c0_43 = arith.constant 0 : index
    %c0_44 = arith.constant 0 : index
    %75 = vector.load %arg16[%c0_43, %c0_44] : memref<16x96xf32, #tpu.memory_space<vmem>>, vector<16x96xf32>
    tpu.vector_store %arg16[%c0_43, %c0_44], %74 {strides = array<i32>} : memref<16x96xf32, #tpu.memory_space<vmem>>, vector<16x96xf32>,
    return
  }
  func.func @transform_0(%arg0: i32) -> (i32, i32) {
    %c0_i32 = arith.constant 0 : i32
    %c0_i32_0 = arith.constant 0 : i32
    %c0_i32_1 = arith.constant 0 : i32
    return %c0_i32, %c0_i32_0 : i32, i32
  }
  func.func @transform_1(%arg0: i32) -> (i32, i32) {
    %c0_i32 = arith.constant 0 : i32
    %c0_i32_0 = arith.constant 0 : i32
    %c0_i32_1 = arith.constant 0 : i32
    return %c0_i32, %c0_i32_0 : i32, i32
  }
  func.func @transform_2(%arg0: i32) -> (i32, i32) {
    %c0_i32 = arith.constant 0 : i32
    %c0_i32_0 = arith.constant 0 : i32
    %c0_i32_1 = arith.constant 0 : i32
    return %c0_i32, %c0_i32_0 : i32, i32
  }
  func.func @transform_3(%arg0: i32) -> (i32, i32) {
    %c0_i32 = arith.constant 0 : i32
    %c0_i32_0 = arith.constant 0 : i32
    %c0_i32_1 = arith.constant 0 : i32
    return %c0_i32, %c0_i32_0 : i32, i32
  }
  func.func @transform_4(%arg0: i32) -> (i32, i32) {
    %c0_i32 = arith.constant 0 : i32
    %c0_i32_0 = arith.constant 0 : i32
    %c0_i32_1 = arith.constant 0 : i32
    return %c0_i32, %c0_i32_0 : i32, i32
  }
  func.func @transform_5(%arg0: i32) -> (i32, i32) {
    %c0_i32 = arith.constant 0 : i32
    %c0_i32_0 = arith.constant 0 : i32
    %c0_i32_1 = arith.constant 0 : i32
    return %c0_i32, %c0_i32_0 : i32, i32
  }
  func.func @transform_6(%arg0: i32) -> (i32, i32) {
    %c0_i32 = arith.constant 0 : i32
    %c0_i32_0 = arith.constant 0 : i32
    %c0_i32_1 = arith.constant 0 : i32
    return %c0_i32, %c0_i32_0 : i32, i32
  }
  func.func @transform_7(%arg0: i32) -> (i32, i32) {
    %c0_i32 = arith.constant 0 : i32
    %c0_i32_0 = arith.constant 0 : i32
    %c0_i32_1 = arith.constant 0 : i32
    return %c0_i32, %c0_i32_0 : i32, i32
  }
  func.func @transform_8(%arg0: i32) -> (i32, i32) {
    %c0_i32 = arith.constant 0 : i32
    %c0_i32_0 = arith.constant 0 : i32
    %c0_i32_1 = arith.constant 0 : i32
    return %c0_i32, %c0_i32_0 : i32, i32
  }
  func.func @transform_9(%arg0: i32) -> (i32, i32) {
    %c0_i32 = arith.constant 0 : i32
    %c0_i32_0 = arith.constant 0 : i32
    %c0_i32_1 = arith.constant 0 : i32
    return %c0_i32, %c0_i32_0 : i32, i32
  }
  func.func @transform_10(%arg0: i32) -> (i32, i32) {
    %c0_i32 = arith.constant 0 : i32
    %c0_i32_0 = arith.constant 0 : i32
    %c0_i32_1 = arith.constant 0 : i32
    return %c0_i32, %c0_i32_0 : i32, i32
  }
  func.func @transform_11(%arg0: i32) -> (i32, i32) {
    %c0_i32 = arith.constant 0 : i32
    %c0_i32_0 = arith.constant 0 : i32
    %c0_i32_1 = arith.constant 0 : i32
    return %c0_i32, %c0_i32_0 : i32, i32
  }
  func.func @transform_12(%arg0: i32) -> (i32, i32) {
    %c0_i32 = arith.constant 0 : i32
    %c0_i32_0 = arith.constant 0 : i32
    %c0_i32_1 = arith.constant 0 : i32
    return %c0_i32, %c0_i32_0 : i32, i32
  }
  func.func @transform_13(%arg0: i32) -> (i32, i32) {
    %c0_i32 = arith.constant 0 : i32
    %c0_i32_0 = arith.constant 0 : i32
    %c0_i32_1 = arith.constant 0 : i32
    return %c0_i32, %c0_i32_0 : i32, i32
  }
  func.func @transform_14(%arg0: i32) -> (i32, i32) {
    %c0_i32 = arith.constant 0 : i32
    %c0_i32_0 = arith.constant 0 : i32
    %c0_i32_1 = arith.constant 0 : i32
    return %c0_i32, %c0_i32_0 : i32, i32
  }
  func.func @transform_15(%arg0: i32) -> (i32, i32) {
    %c0_i32 = arith.constant 0 : i32
    %c0_i32_0 = arith.constant 0 : i32
    %c0_i32_1 = arith.constant 0 : i32
    return %c0_i32, %c0_i32_0 : i32, i32
  }
}

module attributes {stable_mosaic.version = 11 : i64} {
  func.func @_post_kernel(%arg0: i32, %arg1: memref<16x32xf32, #tpu.memory_space<vmem>>, %arg2: memref<16x32xf32, #tpu.memory_space<vmem>>, %arg3: memref<32x32xf32, #tpu.memory_space<vmem>>, %arg4: memref<1x32xf32, #tpu.memory_space<vmem>>, %arg5: memref<1x32xf32, #tpu.memory_space<vmem>>, %arg6: memref<1x32xf32, #tpu.memory_space<vmem>>, %arg7: memref<32x64xf32, #tpu.memory_space<vmem>>, %arg8: memref<1x64xf32, #tpu.memory_space<vmem>>, %arg9: memref<64x32xf32, #tpu.memory_space<vmem>>, %arg10: memref<1x32xf32, #tpu.memory_space<vmem>>, %arg11: memref<1x32xf32, #tpu.memory_space<vmem>>, %arg12: memref<1x32xf32, #tpu.memory_space<vmem>>, %arg13: memref<16x32xf32, #tpu.memory_space<vmem>>) attributes {dimension_semantics = [#tpu.dimension_semantics<arbitrary>], iteration_bounds = array<i64: 1>, scalar_prefetch = 0 : i64, scratch_operands = 0 : i64, tpu.core_type = #tpu.core_type<tc>, window_params = [{pipeline_mode = #tpu.pipeline_mode<synchronous>, transform_indices = @transform_0, window_bounds = array<i64: 16, 32>}, {pipeline_mode = #tpu.pipeline_mode<synchronous>, transform_indices = @transform_1, window_bounds = array<i64: 16, 32>}, {pipeline_mode = #tpu.pipeline_mode<synchronous>, transform_indices = @transform_2, window_bounds = array<i64: 32, 32>}, {pipeline_mode = #tpu.pipeline_mode<synchronous>, transform_indices = @transform_3, window_bounds = array<i64: 1, 32>}, {pipeline_mode = #tpu.pipeline_mode<synchronous>, transform_indices = @transform_4, window_bounds = array<i64: 1, 32>}, {pipeline_mode = #tpu.pipeline_mode<synchronous>, transform_indices = @transform_5, window_bounds = array<i64: 1, 32>}, {pipeline_mode = #tpu.pipeline_mode<synchronous>, transform_indices = @transform_6, window_bounds = array<i64: 32, 64>}, {pipeline_mode = #tpu.pipeline_mode<synchronous>, transform_indices = @transform_7, window_bounds = array<i64: 1, 64>}, {pipeline_mode = #tpu.pipeline_mode<synchronous>, transform_indices = @transform_8, window_bounds = array<i64: 64, 32>}, {pipeline_mode = #tpu.pipeline_mode<synchronous>, transform_indices = @transform_9, window_bounds = array<i64: 1, 32>}, {pipeline_mode = #tpu.pipeline_mode<synchronous>, transform_indices = @transform_10, window_bounds = array<i64: 1, 32>}, {pipeline_mode = #tpu.pipeline_mode<synchronous>, transform_indices = @transform_11, window_bounds = array<i64: 1, 32>}, {pipeline_mode = #tpu.pipeline_mode<synchronous>, transform_indices = @transform_12, window_bounds = array<i64: 16, 32>}]} {
    %c0 = arith.constant 0 : index
    %c0_0 = arith.constant 0 : index
    %0 = vector.load %arg1[%c0, %c0_0] : memref<16x32xf32, #tpu.memory_space<vmem>>, vector<16x32xf32>
    %c0_1 = arith.constant 0 : index
    %c0_2 = arith.constant 0 : index
    %1 = vector.load %arg2[%c0_1, %c0_2] : memref<16x32xf32, #tpu.memory_space<vmem>>, vector<16x32xf32>
    %c0_3 = arith.constant 0 : index
    %c0_4 = arith.constant 0 : index
    %2 = vector.load %arg3[%c0_3, %c0_4] : memref<32x32xf32, #tpu.memory_space<vmem>>, vector<32x32xf32>
    %c0_5 = arith.constant 0 : index
    %c0_6 = arith.constant 0 : index
    %3 = vector.load %arg4[%c0_5, %c0_6] : memref<1x32xf32, #tpu.memory_space<vmem>>, vector<1x32xf32>
    %c0_7 = arith.constant 0 : index
    %c0_8 = arith.constant 0 : index
    %4 = vector.load %arg5[%c0_7, %c0_8] : memref<1x32xf32, #tpu.memory_space<vmem>>, vector<1x32xf32>
    %c0_9 = arith.constant 0 : index
    %c0_10 = arith.constant 0 : index
    %5 = vector.load %arg6[%c0_9, %c0_10] : memref<1x32xf32, #tpu.memory_space<vmem>>, vector<1x32xf32>
    %c0_11 = arith.constant 0 : index
    %c0_12 = arith.constant 0 : index
    %6 = vector.load %arg7[%c0_11, %c0_12] : memref<32x64xf32, #tpu.memory_space<vmem>>, vector<32x64xf32>
    %c0_13 = arith.constant 0 : index
    %c0_14 = arith.constant 0 : index
    %7 = vector.load %arg8[%c0_13, %c0_14] : memref<1x64xf32, #tpu.memory_space<vmem>>, vector<1x64xf32>
    %c0_15 = arith.constant 0 : index
    %c0_16 = arith.constant 0 : index
    %8 = vector.load %arg9[%c0_15, %c0_16] : memref<64x32xf32, #tpu.memory_space<vmem>>, vector<64x32xf32>
    %c0_17 = arith.constant 0 : index
    %c0_18 = arith.constant 0 : index
    %9 = vector.load %arg10[%c0_17, %c0_18] : memref<1x32xf32, #tpu.memory_space<vmem>>, vector<1x32xf32>
    %c0_19 = arith.constant 0 : index
    %c0_20 = arith.constant 0 : index
    %10 = vector.load %arg11[%c0_19, %c0_20] : memref<1x32xf32, #tpu.memory_space<vmem>>, vector<1x32xf32>
    %c0_21 = arith.constant 0 : index
    %c0_22 = arith.constant 0 : index
    %11 = vector.load %arg12[%c0_21, %c0_22] : memref<1x32xf32, #tpu.memory_space<vmem>>, vector<1x32xf32>
    %cst = arith.constant dense<0.000000e+00> : vector<16x32xf32>
    %12 = tpu.matmul %0, %2, %cst {dimension_numbers = #tpu.dot_dimension_numbers<[1], [0], [0], [1], [0, 0, 1, 1], [], []>} : vector<16x32xf32>, vector<32x32xf32>, vector<16x32xf32> -> vector<16x32xf32>
    %13 = vector.broadcast %3 : vector<1x32xf32> to vector<16x32xf32>
    %14 = arith.addf %12, %13 : vector<16x32xf32>
    %15 = arith.addf %14, %1 : vector<16x32xf32>
    %cst_23 = arith.constant dense<0.000000e+00> : vector<16xf32>
    %16 = vector.multi_reduction <add>, %15, %cst_23 [1] : vector<16x32xf32> to vector<16xf32>
    %17 = vector.shape_cast %16 : vector<16xf32> to vector<16x1xf32>
    %cst_24 = arith.constant 3.200000e+01 : f32
    %18 = vector.broadcast %cst_24 : f32 to vector<16x1xf32>
    %19 = arith.divf %17, %18 : vector<16x1xf32>
    %20 = vector.broadcast %19 : vector<16x1xf32> to vector<16x32xf32>
    %21 = arith.subf %15, %20 : vector<16x32xf32>
    %22 = arith.mulf %21, %21 : vector<16x32xf32>
    %cst_25 = arith.constant dense<0.000000e+00> : vector<16xf32>
    %23 = vector.multi_reduction <add>, %22, %cst_25 [1] : vector<16x32xf32> to vector<16xf32>
    %24 = vector.shape_cast %23 : vector<16xf32> to vector<16x1xf32>
    %cst_26 = arith.constant 3.200000e+01 : f32
    %25 = vector.broadcast %cst_26 : f32 to vector<16x1xf32>
    %26 = arith.divf %24, %25 : vector<16x1xf32>
    %27 = vector.broadcast %19 : vector<16x1xf32> to vector<16x32xf32>
    %28 = arith.subf %15, %27 : vector<16x32xf32>
    %cst_27 = arith.constant 9.99999974E-6 : f32
    %29 = vector.broadcast %cst_27 : f32 to vector<16x1xf32>
    %30 = arith.addf %26, %29 : vector<16x1xf32>
    %31 = math.rsqrt %30 : vector<16x1xf32>
    %32 = vector.broadcast %31 : vector<16x1xf32> to vector<16x32xf32>
    %33 = arith.mulf %28, %32 : vector<16x32xf32>
    %34 = vector.broadcast %4 : vector<1x32xf32> to vector<16x32xf32>
    %35 = arith.mulf %33, %34 : vector<16x32xf32>
    %36 = vector.broadcast %5 : vector<1x32xf32> to vector<16x32xf32>
    %37 = arith.addf %35, %36 : vector<16x32xf32>
    %cst_28 = arith.constant dense<0.000000e+00> : vector<16x64xf32>
    %38 = tpu.matmul %37, %6, %cst_28 {dimension_numbers = #tpu.dot_dimension_numbers<[1], [0], [0], [1], [0, 0, 1, 1], [], []>} : vector<16x32xf32>, vector<32x64xf32>, vector<16x64xf32> -> vector<16x64xf32>
    %39 = vector.broadcast %7 : vector<1x64xf32> to vector<16x64xf32>
    %40 = arith.addf %38, %39 : vector<16x64xf32>
    %cst_29 = arith.constant 0.000000e+00 : f32
    %41 = vector.broadcast %cst_29 : f32 to vector<16x64xf32>
    %42 = arith.maximumf %40, %41 : vector<16x64xf32>
    %cst_30 = arith.constant dense<0.000000e+00> : vector<16x32xf32>
    %43 = tpu.matmul %42, %8, %cst_30 {dimension_numbers = #tpu.dot_dimension_numbers<[1], [0], [0], [1], [0, 0, 1, 1], [], []>} : vector<16x64xf32>, vector<64x32xf32>, vector<16x32xf32> -> vector<16x32xf32>
    %44 = vector.broadcast %9 : vector<1x32xf32> to vector<16x32xf32>
    %45 = arith.addf %43, %44 : vector<16x32xf32>
    %46 = arith.addf %45, %37 : vector<16x32xf32>
    %cst_31 = arith.constant dense<0.000000e+00> : vector<16xf32>
    %47 = vector.multi_reduction <add>, %46, %cst_31 [1] : vector<16x32xf32> to vector<16xf32>
    %48 = vector.shape_cast %47 : vector<16xf32> to vector<16x1xf32>
    %cst_32 = arith.constant 3.200000e+01 : f32
    %49 = vector.broadcast %cst_32 : f32 to vector<16x1xf32>
    %50 = arith.divf %48, %49 : vector<16x1xf32>
    %51 = vector.broadcast %50 : vector<16x1xf32> to vector<16x32xf32>
    %52 = arith.subf %46, %51 : vector<16x32xf32>
    %53 = arith.mulf %52, %52 : vector<16x32xf32>
    %cst_33 = arith.constant dense<0.000000e+00> : vector<16xf32>
    %54 = vector.multi_reduction <add>, %53, %cst_33 [1] : vector<16x32xf32> to vector<16xf32>
    %55 = vector.shape_cast %54 : vector<16xf32> to vector<16x1xf32>
    %cst_34 = arith.constant 3.200000e+01 : f32
    %56 = vector.broadcast %cst_34 : f32 to vector<16x1xf32>
    %57 = arith.divf %55, %56 : vector<16x1xf32>
    %58 = vector.broadcast %50 : vector<16x1xf32> to vector<16x32xf32>
    %59 = arith.subf %46, %58 : vector<16x32xf32>
    %cst_35 = arith.constant 9.99999974E-6 : f32
    %60 = vector.broadcast %cst_35 : f32 to vector<16x1xf32>
    %61 = arith.addf %57, %60 : vector<16x1xf32>
    %62 = math.rsqrt %61 : vector<16x1xf32>
    %63 = vector.broadcast %62 : vector<16x1xf32> to vector<16x32xf32>
    %64 = arith.mulf %59, %63 : vector<16x32xf32>
    %65 = vector.broadcast %10 : vector<1x32xf32> to vector<16x32xf32>
    %66 = arith.mulf %64, %65 : vector<16x32xf32>
    %67 = vector.broadcast %11 : vector<1x32xf32> to vector<16x32xf32>
    %68 = arith.addf %66, %67 : vector<16x32xf32>
    %c0_36 = arith.constant 0 : index
    %c0_37 = arith.constant 0 : index
    %69 = vector.load %arg13[%c0_36, %c0_37] : memref<16x32xf32, #tpu.memory_space<vmem>>, vector<16x32xf32>
    tpu.vector_store %arg13[%c0_36, %c0_37], %68 {strides = array<i32>} : memref<16x32xf32, #tpu.memory_space<vmem>>, vector<16x32xf32>,
    return
  }
  func.func @transform_0(%arg0: i32) -> (i32, i32) {
    %c0_i32 = arith.constant 0 : i32
    %c0_i32_0 = arith.constant 0 : i32
    %c0_i32_1 = arith.constant 0 : i32
    return %c0_i32, %c0_i32_0 : i32, i32
  }
  func.func @transform_1(%arg0: i32) -> (i32, i32) {
    %c0_i32 = arith.constant 0 : i32
    %c0_i32_0 = arith.constant 0 : i32
    %c0_i32_1 = arith.constant 0 : i32
    return %c0_i32, %c0_i32_0 : i32, i32
  }
  func.func @transform_2(%arg0: i32) -> (i32, i32) {
    %c0_i32 = arith.constant 0 : i32
    %c0_i32_0 = arith.constant 0 : i32
    %c0_i32_1 = arith.constant 0 : i32
    return %c0_i32, %c0_i32_0 : i32, i32
  }
  func.func @transform_3(%arg0: i32) -> (i32, i32) {
    %c0_i32 = arith.constant 0 : i32
    %c0_i32_0 = arith.constant 0 : i32
    %c0_i32_1 = arith.constant 0 : i32
    return %c0_i32, %c0_i32_0 : i32, i32
  }
  func.func @transform_4(%arg0: i32) -> (i32, i32) {
    %c0_i32 = arith.constant 0 : i32
    %c0_i32_0 = arith.constant 0 : i32
    %c0_i32_1 = arith.constant 0 : i32
    return %c0_i32, %c0_i32_0 : i32, i32
  }
  func.func @transform_5(%arg0: i32) -> (i32, i32) {
    %c0_i32 = arith.constant 0 : i32
    %c0_i32_0 = arith.constant 0 : i32
    %c0_i32_1 = arith.constant 0 : i32
    return %c0_i32, %c0_i32_0 : i32, i32
  }
  func.func @transform_6(%arg0: i32) -> (i32, i32) {
    %c0_i32 = arith.constant 0 : i32
    %c0_i32_0 = arith.constant 0 : i32
    %c0_i32_1 = arith.constant 0 : i32
    return %c0_i32, %c0_i32_0 : i32, i32
  }
  func.func @transform_7(%arg0: i32) -> (i32, i32) {
    %c0_i32 = arith.constant 0 : i32
    %c0_i32_0 = arith.constant 0 : i32
    %c0_i32_1 = arith.constant 0 : i32
    return %c0_i32, %c0_i32_0 : i32, i32
  }
  func.func @transform_8(%arg0: i32) -> (i32, i32) {
    %c0_i32 = arith.constant 0 : i32
    %c0_i32_0 = arith.constant 0 : i32
    %c0_i32_1 = arith.constant 0 : i32
    return %c0_i32, %c0_i32_0 : i32, i32
  }
  func.func @transform_9(%arg0: i32) -> (i32, i32) {
    %c0_i32 = arith.constant 0 : i32
    %c0_i32_0 = arith.constant 0 : i32
    %c0_i32_1 = arith.constant 0 : i32
    return %c0_i32, %c0_i32_0 : i32, i32
  }
  func.func @transform_10(%arg0: i32) -> (i32, i32) {
    %c0_i32 = arith.constant 0 : i32
    %c0_i32_0 = arith.constant 0 : i32
    %c0_i32_1 = arith.constant 0 : i32
    return %c0_i32, %c0_i32_0 : i32, i32
  }
  func.func @transform_11(%arg0: i32) -> (i32, i32) {
    %c0_i32 = arith.constant 0 : i32
    %c0_i32_0 = arith.constant 0 : i32
    %c0_i32_1 = arith.constant 0 : i32
    return %c0_i32, %c0_i32_0 : i32, i32
  }
  func.func @transform_12(%arg0: i32) -> (i32, i32) {
    %c0_i32 = arith.constant 0 : i32
    %c0_i32_0 = arith.constant 0 : i32
    %c0_i32_1 = arith.constant 0 : i32
    return %c0_i32, %c0_i32_0 : i32, i32
  }
}

module attributes {stable_mosaic.version = 11 : i64} {
  func.func @_head_kernel(%arg0: i32, %arg1: memref<2x256xf32, #tpu.memory_space<vmem>>, %arg2: memref<256x64xf32, #tpu.memory_space<vmem>>, %arg3: memref<1x64xf32, #tpu.memory_space<vmem>>, %arg4: memref<64x128xf32, #tpu.memory_space<vmem>>, %arg5: memref<1x128xf32, #tpu.memory_space<vmem>>, %arg6: memref<2x128xf32, #tpu.memory_space<vmem>>) attributes {dimension_semantics = [#tpu.dimension_semantics<arbitrary>], iteration_bounds = array<i64: 1>, scalar_prefetch = 0 : i64, scratch_operands = 0 : i64, tpu.core_type = #tpu.core_type<tc>, window_params = [{pipeline_mode = #tpu.pipeline_mode<synchronous>, transform_indices = @transform_0, window_bounds = array<i64: 2, 256>}, {pipeline_mode = #tpu.pipeline_mode<synchronous>, transform_indices = @transform_1, window_bounds = array<i64: 256, 64>}, {pipeline_mode = #tpu.pipeline_mode<synchronous>, transform_indices = @transform_2, window_bounds = array<i64: 1, 64>}, {pipeline_mode = #tpu.pipeline_mode<synchronous>, transform_indices = @transform_3, window_bounds = array<i64: 64, 128>}, {pipeline_mode = #tpu.pipeline_mode<synchronous>, transform_indices = @transform_4, window_bounds = array<i64: 1, 128>}, {pipeline_mode = #tpu.pipeline_mode<synchronous>, transform_indices = @transform_5, window_bounds = array<i64: 2, 128>}]} {
    %c0 = arith.constant 0 : index
    %c0_0 = arith.constant 0 : index
    %0 = vector.load %arg1[%c0, %c0_0] : memref<2x256xf32, #tpu.memory_space<vmem>>, vector<2x256xf32>
    %c0_1 = arith.constant 0 : index
    %c0_2 = arith.constant 0 : index
    %1 = vector.load %arg2[%c0_1, %c0_2] : memref<256x64xf32, #tpu.memory_space<vmem>>, vector<256x64xf32>
    %cst = arith.constant dense<0.000000e+00> : vector<2x64xf32>
    %2 = tpu.matmul %0, %1, %cst {dimension_numbers = #tpu.dot_dimension_numbers<[1], [0], [0], [1], [0, 0, 1, 1], [], []>} : vector<2x256xf32>, vector<256x64xf32>, vector<2x64xf32> -> vector<2x64xf32>
    %c0_3 = arith.constant 0 : index
    %c0_4 = arith.constant 0 : index
    %3 = vector.load %arg3[%c0_3, %c0_4] : memref<1x64xf32, #tpu.memory_space<vmem>>, vector<1x64xf32>
    %4 = vector.broadcast %3 : vector<1x64xf32> to vector<2x64xf32>
    %5 = arith.addf %2, %4 : vector<2x64xf32>
    %cst_5 = arith.constant 0.000000e+00 : f32
    %6 = vector.broadcast %cst_5 : f32 to vector<2x64xf32>
    %7 = arith.maximumf %5, %6 : vector<2x64xf32>
    %c0_6 = arith.constant 0 : index
    %c0_7 = arith.constant 0 : index
    %8 = vector.load %arg4[%c0_6, %c0_7] : memref<64x128xf32, #tpu.memory_space<vmem>>, vector<64x128xf32>
    %cst_8 = arith.constant dense<0.000000e+00> : vector<2x128xf32>
    %9 = tpu.matmul %7, %8, %cst_8 {dimension_numbers = #tpu.dot_dimension_numbers<[1], [0], [0], [1], [0, 0, 1, 1], [], []>} : vector<2x64xf32>, vector<64x128xf32>, vector<2x128xf32> -> vector<2x128xf32>
    %c0_9 = arith.constant 0 : index
    %c0_10 = arith.constant 0 : index
    %10 = vector.load %arg5[%c0_9, %c0_10] : memref<1x128xf32, #tpu.memory_space<vmem>>, vector<1x128xf32>
    %11 = vector.broadcast %10 : vector<1x128xf32> to vector<2x128xf32>
    %12 = arith.addf %9, %11 : vector<2x128xf32>
    %c0_11 = arith.constant 0 : index
    %c0_12 = arith.constant 0 : index
    %13 = vector.load %arg6[%c0_11, %c0_12] : memref<2x128xf32, #tpu.memory_space<vmem>>, vector<2x128xf32>
    tpu.vector_store %arg6[%c0_11, %c0_12], %12 {strides = array<i32>} : memref<2x128xf32, #tpu.memory_space<vmem>>, vector<2x128xf32>,
    return
  }
  func.func @transform_0(%arg0: i32) -> (i32, i32) {
    %c0_i32 = arith.constant 0 : i32
    %c0_i32_0 = arith.constant 0 : i32
    %c0_i32_1 = arith.constant 0 : i32
    return %c0_i32, %c0_i32_0 : i32, i32
  }
  func.func @transform_1(%arg0: i32) -> (i32, i32) {
    %c0_i32 = arith.constant 0 : i32
    %c0_i32_0 = arith.constant 0 : i32
    %c0_i32_1 = arith.constant 0 : i32
    return %c0_i32, %c0_i32_0 : i32, i32
  }
  func.func @transform_2(%arg0: i32) -> (i32, i32) {
    %c0_i32 = arith.constant 0 : i32
    %c0_i32_0 = arith.constant 0 : i32
    %c0_i32_1 = arith.constant 0 : i32
    return %c0_i32, %c0_i32_0 : i32, i32
  }
  func.func @transform_3(%arg0: i32) -> (i32, i32) {
    %c0_i32 = arith.constant 0 : i32
    %c0_i32_0 = arith.constant 0 : i32
    %c0_i32_1 = arith.constant 0 : i32
    return %c0_i32, %c0_i32_0 : i32, i32
  }
  func.func @transform_4(%arg0: i32) -> (i32, i32) {
    %c0_i32 = arith.constant 0 : i32
    %c0_i32_0 = arith.constant 0 : i32
    %c0_i32_1 = arith.constant 0 : i32
    return %c0_i32, %c0_i32_0 : i32, i32
  }
  func.func @transform_5(%arg0: i32) -> (i32, i32) {
    %c0_i32 = arith.constant 0 : i32
    %c0_i32_0 = arith.constant 0 : i32
    %c0_i32_1 = arith.constant 0 : i32
    return %c0_i32, %c0_i32_0 : i32, i32
  }
}

</mosaic_0001>

<bundles_post_ra>
// kernel: transformer_forward.6
= control target key start
LH: loop header
LB: loop body
LE: loop exit
PB: predicated region body
PF: predicated region fallthrough
CT: control target
= control target key end

     0   :  { %vm42_vm0 = vcmask 1043456   ;;  %vm35_vm1 = vcmask 31744   ;;  %vm125_vm2 = vcmask 261120   ;;  %vm220_vm3 = vcmask 785408   ;;  %s348_s2 = inlined_call_operand.vmem [shape: f32[4,32], index: 2, kind: input, shape index: {}]   ;;  %s349_s0 = inlined_call_operand.vmem [shape: f32[16,4], index: 0, kind: input, shape index: {}]   ;;  %s350_s4 = inlined_call_operand.vmem [shape: f32[32,96], index: 4, kind: input, shape index: {}]   ;;  %s351_s3 = inlined_call_operand.vmem [shape: f32[1,32], index: 3, kind: input, shape index: {}]   ;;  %s352_s1 = inlined_call_operand.vmem [shape: f32[16,32], index: 1, kind: input, shape index: {}]   ;;  %s353_s6 = inlined_call_operand.vmem [shape: f32[16,32], index: 6, kind: output, shape index: {0}]   ;;  %s354_s5 = inlined_call_operand.vmem [shape: f32[1,96], index: 5, kind: input, shape index: {}]   ;;  %s355_s7 = inlined_call_operand.vmem [shape: f32[16,96], index: 7, kind: output, shape index: {1}]  }
   0x1   :  { %v27_v0 = vld [vmem:[%s348_s2] sm:$0xf]  ;;  %v26_v2 = vld [vmem:[%s349_s0 + $0x8] sm:$0xff]  ;;  %v131_v3 = vld [vmem:[%s350_s4 + $0x18] sm:$0xff] }
   0x2   :  { %v25_v1 = vld [vmem:[%s349_s0] sm:$0xff]  ;;  %247 = vmatprep.subr.msk.mxu0 %vm42_vm0, %v27_v0  ;;  %252 = vmatprep.subr.mxu1 %v131_v3  ;;  %v130_v4 = vld [vmem:[%s350_s4 + $0x10] sm:$0xff]  ;;  %v129_v5 = vld [vmem:[%s350_s4 + $0x8] sm:$0xff] }
   0x3   :  { %249 = vmatprep.mubr.msk.f32.mxu0 %vm35_vm1, %v25_v1  ;;  %248 = vmatpush3.msk.msra.mxu0 %vm42_vm0, %v27_v0  ;;  %v128_v6 = vld [vmem:[%s350_s4] sm:$0xff]  ;;  %v122_v9 = vld [vmem:[%s352_s1 + $0x8] sm:$0xff] }
   0x4   :  { %250 = vmatmul.mubr.msk.f32.vlgmr.msra.gmra.mxu0 %vm35_vm1, %v26_v2  ;;  %253 = vmatpush3.msra.mxu1 %v131_v3  ;;  %v231_v7 = vld [vmem:[%s351_s3] ss:$0 sm:$0xff] }
   0x5   :  { %254 = vmatprep.subr.mxu1 %v130_v4  ;;  %v121_v12 = vld [vmem:[%s352_s1] sm:$0xff] }
   0x6   :  { %255 = vmatpush3.msra.mxu1 %v130_v4  ;;  %v235_v16 = vld [vmem:[%s354_s5] ss:$0 sm:$0xff] }
   0x7   :  { %256 = vmatprep.subr.mxu1 %v129_v5 }
   0x8   :  { %257 = vmatpush3.msra.mxu1 %v129_v5 }
   0x9   :  { %258 = vmatprep.subr.mxu1 %v128_v6 }
   0xa   :  { %259 = vmatpush3.msra.mxu1 %v128_v6 }
  0xc4   :  { %v251_v8 = vpop.f32.mrf.mxu0 }
  0xc5   :  { %v118_v10 = vadd.f32 %v251_v8, %v231_v7 }
  0xc6   :  { %v112_v11 = vpop.f32.mrf.mxu0 }
  0xc7   :  { %v124_v13 = vadd.f32 %v122_v9, %v118_v10  ;;  %v113_v14 = vadd.f32 %v231_v7, %v112_v11 }
  0xc9   :  { %v123_v15 = vadd.f32 %v121_v12, %v113_v14  ;;  %127 = vst.msk [vmem:[%s353_s6 + $0x8] sm:$0xff] %vm125_vm2, %v124_v13 }
  0xcb   :  { %126 = vst.msk [vmem:[%s353_s6] sm:$0xff] %vm125_vm2, %v123_v15  ;;  %260 = vmatprep.mubr.msk.f32.mxu1 %vm125_vm2, %v123_v15 }
  0xcc   :  { %261 = vmatmul.mubr.msk.f32.vlgmr.msra.gmra.mxu1 %vm125_vm2, %v124_v13 }
 0x18c   :  { %v262_v17 = vpop.f32.mrf.mxu1 }
 0x18d   :  { %v217_v18 = vadd.f32 %v262_v17, %v235_v16 }
 0x18e   :  { %v211_v19 = vpop.f32.mrf.mxu1 }
 0x18f   :  { %222 = vst.msk [vmem:[%s355_s7 + $0x8] sm:$0xff] %vm220_vm3, %v217_v18  ;;  %v212_v20 = vadd.f32 %v235_v16, %v211_v19 }
 0x191   :  { %221 = vst.msk [vmem:[%s355_s7] sm:$0xff] %vm220_vm3, %v212_v20 }

// kernel: transformer_forward.10
= control target key start
LH: loop header
LB: loop body
LE: loop exit
PB: predicated region body
PF: predicated region fallthrough
CT: control target
= control target key end

     0   :  { %vm74_vm0 = vcmask 261120   ;;  %vm296_vm1 = vcmask 523264   ;;  %s678_s2 = inlined_call_operand.vmem [shape: f32[32,32], index: 2, kind: input, shape index: {}]   ;;  %s679_s0 = inlined_call_operand.vmem [shape: f32[16,32], index: 0, kind: input, shape index: {}]   ;;  %s680_s3 = inlined_call_operand.vmem [shape: f32[1,32], index: 3, kind: input, shape index: {}]   ;;  %s681_s1 = inlined_call_operand.vmem [shape: f32[16,32], index: 1, kind: input, shape index: {}]   ;;  %s682_s6 = inlined_call_operand.vmem [shape: f32[32,64], index: 6, kind: input, shape index: {}]   ;;  %s683_s8 = inlined_call_operand.vmem [shape: f32[64,32], index: 8, kind: input, shape index: {}]   ;;  %s684_s4 = inlined_call_operand.vmem [shape: f32[1,32], index: 4, kind: input, shape index: {}]   ;;  %s685_s5 = inlined_call_operand.vmem [shape: f32[1,32], index: 5, kind: input, shape index: {}]   ;;  %s686_s7 = inlined_call_operand.vmem [shape: f32[1,64], index: 7, kind: input, shape index: {}]   ;;  %s687_s9 = inlined_call_operand.vmem [shape: f32[1,32], index: 9, kind: input, shape index: {}]   ;;  %s688_s10 = inlined_call_operand.vmem [shape: f32[1,32], index: 10, kind: input, shape index: {}]   ;;  %s689_s11 = inlined_call_operand.vmem [shape: f32[1,32], index: 11, kind: input, shape index: {}]   ;;  %s690_s12 = inlined_call_operand.vmem [shape: f32[16,32], index: 12, kind: output, shape index: {}]  }
   0x1   :  { %v48_v0 = vld [vmem:[%s678_s2 + $0x18] sm:$0xff]  ;;  %v47_v1 = vld [vmem:[%s678_s2 + $0x10] sm:$0xff]  ;;  %v41_v2 = vld [vmem:[%s679_s0] sm:$0xff] }
   0x2   :  { %463 = vmatprep.subr.mxu1 %v48_v0  ;;  %v46_v3 = vld [vmem:[%s678_s2 + $0x8] sm:$0xff]  ;;  %471 = vmatprep.mubr.msk.f32.mxu1 %vm74_vm0, %v41_v2  ;;  %v45_v4 = vld [vmem:[%s678_s2] sm:$0xff]  ;;  %v55_v27 = vld [vmem:[%s682_s6 + $0x18] sm:$0xff] }
   0x3   :  { %464 = vmatpush3.msra.mxu1 %v48_v0  ;;  %v42_v5 = vld [vmem:[%s679_s0 + $0x8] sm:$0xff]  ;;  %v428_v7 = vld [vmem:[%s680_s3] ss:$0 sm:$0xff]  ;;  %v54_v28 = vld [vmem:[%s682_s6 + $0x10] sm:$0xff] }
   0x4   :  { %465 = vmatprep.subr.mxu1 %v47_v1  ;;  %v43_v9 = vld [vmem:[%s681_s1] sm:$0xff]  ;;  %v44_v12 = vld [vmem:[%s681_s1 + $0x8] sm:$0xff]  ;;  %v64_v31 = vld [vmem:[%s683_s8 + $0x38] sm:$0xff] }
   0x5   :  { %466 = vmatpush3.msra.mxu1 %v47_v1  ;;  %v53_v29 = vld [vmem:[%s682_s6 + $0x8] sm:$0xff]  ;;  %v52_v30 = vld [vmem:[%s682_s6] sm:$0xff]  ;;  %v63_v32 = vld [vmem:[%s683_s8 + $0x30] sm:$0xff]  ;;  %485 = vmatprep.subr.mxu0 %v64_v31 }
   0x6   :  { %467 = vmatprep.subr.mxu1 %v46_v3  ;;  %486 = vmatpush3.msra.mxu0 %v64_v31  ;;  %v62_v33 = vld [vmem:[%s683_s8 + $0x28] sm:$0xff]  ;;  %v61_v34 = vld [vmem:[%s683_s8 + $0x20] sm:$0xff]  ;;  %v60_v51 = vld [vmem:[%s683_s8 + $0x18] sm:$0xff] }
   0x7   :  { %468 = vmatpush3.msra.mxu1 %v46_v3  ;;  %487 = vmatprep.subr.mxu0 %v63_v32  ;;  %v431_v42 = vld [vmem:[%s684_s4] ss:$0 sm:$0xff]  ;;  %v59_v52 = vld [vmem:[%s683_s8 + $0x10] sm:$0xff]  ;;  %v58_v53 = vld [vmem:[%s683_s8 + $0x8] sm:$0xff] }
   0x8   :  { %469 = vmatprep.subr.mxu1 %v45_v4  ;;  %488 = vmatpush3.msra.mxu0 %v63_v32  ;;  %v432_v44 = vld [vmem:[%s685_s5] ss:$0 sm:$0xff] }
   0x9   :  { %470 = vmatpush3.msra.mxu1 %v45_v4  ;;  %489 = vmatprep.subr.mxu0 %v62_v33  ;;  %v57_v54 = vld [vmem:[%s683_s8] sm:$0xff] }
   0xa   :  { %472 = vmatmul.mubr.msk.f32.vlgmr.msra.gmra.mxu1 %vm74_vm0, %v42_v5  ;;  %474 = vmatprep.subr.mxu1 %v55_v27  ;;  %v433_v55 = vld [vmem:[%s686_s7] ss:$0 sm:$0xff] }
   0xb   :  { %475 = vmatpush3.msra.mxu1 %v55_v27  ;;  %490 = vmatpush3.msra.mxu0 %v62_v33  ;;  %v436_v62 = vld [vmem:[%s687_s9] ss:$0 sm:$0xff] }
   0xc   :  { %476 = vmatprep.subr.mxu1 %v54_v28  ;;  %491 = vmatprep.subr.mxu0 %v61_v34  ;;  %v440_v27 = vld [vmem:[%s689_s11] ss:$0 sm:$0xff] }
   0xd   :  { %477 = vmatpush3.msra.mxu1 %v54_v28  ;;  %492 = vmatpush3.msra.mxu0 %v61_v34 }
   0xe   :  { %478 = vmatprep.subr.mxu1 %v53_v29  ;;  %493 = vmatprep.subr.mxu0 %v60_v51 }
   0xf   :  { %479 = vmatpush3.msra.mxu1 %v53_v29  ;;  %494 = vmatpush3.msra.mxu0 %v60_v51 }
  0x10   :  { %480 = vmatprep.subr.mxu1 %v52_v30  ;;  %495 = vmatprep.subr.mxu0 %v59_v52 }
  0x11   :  { %481 = vmatpush3.msra.mxu1 %v52_v30  ;;  %496 = vmatpush3.msra.mxu0 %v59_v52 }
  0x12   :  { %497 = vmatprep.subr.mxu0 %v58_v53 }
  0x13   :  { %498 = vmatpush3.msra.mxu0 %v58_v53 }
  0x14   :  { %499 = vmatprep.subr.mxu0 %v57_v54 }
  0x15   :  { %500 = vmatpush3.msra.mxu0 %v57_v54 }
  0xca   :  { %v473_v6 = vpop.f32.mrf.mxu1 }
  0xcb   :  { %v153_v10 = vadd.f32 %v473_v6, %v428_v7 }
  0xcc   :  { %v147_v8 = vpop.f32.mrf.mxu1 }
  0xcd   :  { %v148_v11 = vadd.f32 %v428_v7, %v147_v8  ;;  %v157_v15 = vadd.f32 %v153_v10, %v44_v12 }
  0xcf   :  { %v156_v13 = vadd.f32 %v148_v11, %v43_v9  ;;  %v161_v16 = vsel %vm74_vm0, %v157_v15, 0.0 }
  0xd1   :  { %v158_v14 = vsel %vm74_vm0, %v156_v13, 0.0 }
  0xd2   :  { %159 = vadd.xlane.f32.xlu0 %v158_v14 }
  0xd6   :  { %162 = vadd.xlane.f32.xlu0 %v161_v16 }
 0x15b   :  { %v160_v17 = vpop.xlane.xlu0 %159 }
 0x15c   :  { %v165_v18 = vmul.f32 0.03125, %v160_v17 }
 0x15e   :  { %v167_v19 = vsub.f32 %v156_v13, %v165_v18 }
 0x15f   :  { %v163_v20 = vpop.xlane.xlu0 %162 }
 0x160   :  { %v166_v21 = vmul.f32 0.03125, %v163_v20  ;;  %v169_v22 = vmul.f32 %v167_v19, %v167_v19 }
 0x162   :  { %v168_v23 = vsub.f32 %v157_v15, %v166_v21  ;;  %v171_v24 = vsel %vm74_vm0, %v169_v22, 0.0 }
 0x163   :  { %172 = vadd.xlane.f32.xlu1 %v171_v24  ;;  %v439_v24 = vld [vmem:[%s688_s10] ss:$0 sm:$0xff] }
 0x164   :  { %v170_v25 = vmul.f32 %v168_v23, %v168_v23 }
 0x166   :  { %v174_v26 = vsel %vm74_vm0, %v170_v25, 0.0 }
 0x167   :  { %175 = vadd.xlane.f32.xlu1 %v174_v26 }
 0x1ec   :  { %v173_v35 = vpop.xlane.xlu1 %172 }
 0x1ed   :  { %v177_v36 = vmul.f32 0.03125, %v173_v35 }
 0x1ef   :  { %v179_v37 = vadd.f32 1e-05, %v177_v36 }
 0x1f0   :  { %v176_v38 = vpop.xlane.xlu1 %175 }
 0x1f1   :  { %504 = vrsqrt.f32 %v179_v37  ;;  %v178_v39 = vmul.f32 0.03125, %v176_v38 }
 0x1f3   :  { %v180_v40 = vadd.f32 1e-05, %v178_v39 }
 0x1f5   :  { %506 = vrsqrt.f32 %v180_v40 }
 0x1fe   :  { %v505_v41 = vpop.eup %504 }
 0x1ff   :  { %v183_v43 = vmul.f32 %v505_v41, %v167_v19 }
 0x201   :  { %v191_v45 = vmul.f32 %v431_v42, %v183_v43 }
 0x202   :  { %v507_v46 = vpop.eup %506 }
 0x203   :  { %v184_v47 = vmul.f32 %v507_v46, %v168_v23  ;;  %v199_v48 = vadd.f32 %v432_v44, %v191_v45 }
 0x205   :  { %v192_v49 = vmul.f32 %v431_v42, %v184_v47  ;;  %482 = vmatprep.mubr.msk.f32.mxu1 %vm74_vm0, %v199_v48 }
 0x207   :  { %v200_v50 = vadd.f32 %v432_v44, %v192_v49 }
 0x209   :  { %483 = vmatmul.mubr.msk.f32.vlgmr.msra.gmra.mxu1 %vm74_vm0, %v200_v50 }
 0x2c9   :  { %v484_v56 = vpop.f32.mrf.mxu1 }
 0x2ca   :  { %v285_v57 = vadd.f32 %v484_v56, %v433_v55 }
 0x2cb   :  { %v279_v58 = vpop.f32.mrf.mxu1 }
 0x2cc   :  { %v280_v59 = vadd.f32 %v433_v55, %v279_v58  ;;  %v289_v61 = vmax.f32 %v285_v57, 0.0 }
 0x2ce   :  { %v288_v60 = vmax.f32 %v280_v59, 0.0 }
 0x2d0   :  { %501 = vmatprep.mubr.msk.f32.mxu0 %vm296_vm1, %v288_v60 }
 0x2d1   :  { %502 = vmatmul.mubr.msk.f32.vlgmr.msra.gmra.mxu0 %vm296_vm1, %v289_v61 }
 0x391   :  { %v503_v63 = vpop.f32.mrf.mxu0 }
 0x392   :  { %v375_v0 = vadd.f32 %v503_v63, %v436_v62 }
 0x393   :  { %v369_v1 = vpop.f32.mrf.mxu0 }
 0x394   :  { %v370_v2 = vadd.f32 %v436_v62, %v369_v1  ;;  %v379_v3 = vadd.f32 %v375_v0, %v200_v50 }
 0x396   :  { %v383_v4 = vsel %vm74_vm0, %v379_v3, 0.0  ;;  %v378_v5 = vadd.f32 %v370_v2, %v199_v48 }
 0x397   :  { %384 = vadd.xlane.f32.xlu1 %v383_v4 }
 0x398   :  { %v380_v6 = vsel %vm74_vm0, %v378_v5, 0.0 }
 0x399   :  { %381 = vadd.xlane.f32.xlu0 %v380_v6 }
 0x420   :  { %v385_v7 = vpop.xlane.xlu1 %384 }
 0x421   :  { %v387_v8 = vmul.f32 0.03125, %v385_v7 }
 0x422   :  { %v382_v9 = vpop.xlane.xlu0 %381 }
 0x423   :  { %v389_v10 = vsub.f32 %v379_v3, %v387_v8  ;;  %v386_v11 = vmul.f32 0.03125, %v382_v9 }
 0x425   :  { %v388_v12 = vsub.f32 %v378_v5, %v386_v11  ;;  %v391_v13 = vmul.f32 %v389_v10, %v389_v10 }
 0x427   :  { %v395_v14 = vsel %vm74_vm0, %v391_v13, 0.0  ;;  %v390_v15 = vmul.f32 %v388_v12, %v388_v12 }
 0x428   :  { %396 = vadd.xlane.f32.xlu1 %v395_v14 }
 0x429   :  { %v392_v16 = vsel %vm74_vm0, %v390_v15, 0.0 }
 0x42a   :  { %393 = vadd.xlane.f32.xlu0 %v392_v16 }
 0x4b1   :  { %v397_v17 = vpop.xlane.xlu1 %396 }
 0x4b2   :  { %v399_v18 = vmul.f32 0.03125, %v397_v17 }
 0x4b3   :  { %v394_v19 = vpop.xlane.xlu0 %393 }
 0x4b4   :  { %v401_v20 = vadd.f32 1e-05, %v399_v18  ;;  %v398_v21 = vmul.f32 0.03125, %v394_v19 }
 0x4b6   :  { %508 = vrsqrt.f32 %v401_v20  ;;  %v400_v22 = vadd.f32 1e-05, %v398_v21 }
 0x4b8   :  { %510 = vrsqrt.f32 %v400_v22 }
 0x4c3   :  { %v509_v23 = vpop.eup %508 }
 0x4c4   :  { %v405_v25 = vmul.f32 %v509_v23, %v389_v10 }
 0x4c5   :  { %v511_v26 = vpop.eup %510 }
 0x4c6   :  { %v413_v28 = vmul.f32 %v439_v24, %v405_v25  ;;  %v404_v29 = vmul.f32 %v511_v26, %v388_v12 }
 0x4c8   :  { %v421_v30 = vadd.f32 %v440_v27, %v413_v28  ;;  %v412_v31 = vmul.f32 %v439_v24, %v404_v29 }
 0x4ca   :  { %423 = vst.msk [vmem:[%s690_s12 + $0x8] sm:$0xff] %vm74_vm0, %v421_v30  ;;  %v420_v32 = vadd.f32 %v440_v27, %v412_v31 }
 0x4cc   :  { %422 = vst.msk [vmem:[%s690_s12] sm:$0xff] %vm74_vm0, %v420_v32 }

// kernel: transformer_forward.8
= control target key start
LH: loop header
LB: loop body
LE: loop exit
PB: predicated region body
PF: predicated region fallthrough
CT: control target
= control target key end

     0   :  { %vm82_vm0 = vcmask 261120   ;;  %vm304_vm1 = vcmask 523264   ;;  %vm524_vm2 = vcmask 785408   ;;  %s843_s2 = inlined_call_operand.vmem [shape: f32[32,32], index: 2, kind: input, shape index: {}]   ;;  %s844_s0 = inlined_call_operand.vmem [shape: f32[16,32], index: 0, kind: input, shape index: {}]   ;;  %s845_s3 = inlined_call_operand.vmem [shape: f32[1,32], index: 3, kind: input, shape index: {}]   ;;  %s846_s1 = inlined_call_operand.vmem [shape: f32[16,32], index: 1, kind: input, shape index: {}]   ;;  %s847_s6 = inlined_call_operand.vmem [shape: f32[32,64], index: 6, kind: input, shape index: {}]   ;;  %s848_s8 = inlined_call_operand.vmem [shape: f32[64,32], index: 8, kind: input, shape index: {}]   ;;  %s849_s4 = inlined_call_operand.vmem [shape: f32[1,32], index: 4, kind: input, shape index: {}]   ;;  %s850_s5 = inlined_call_operand.vmem [shape: f32[1,32], index: 5, kind: input, shape index: {}]   ;;  %s851_s7 = inlined_call_operand.vmem [shape: f32[1,64], index: 7, kind: input, shape index: {}]   ;;  %s852_s9 = inlined_call_operand.vmem [shape: f32[1,32], index: 9, kind: input, shape index: {}]   ;;  %s853_s12 = inlined_call_operand.vmem [shape: f32[32,96], index: 12, kind: input, shape index: {}]   ;;  %s854_s10 = inlined_call_operand.vmem [shape: f32[1,32], index: 10, kind: input, shape index: {}]   ;;  %s855_s11 = inlined_call_operand.vmem [shape: f32[1,32], index: 11, kind: input, shape index: {}]   ;;  %s856_s14 = inlined_call_operand.vmem [shape: f32[16,32], index: 14, kind: output, shape index: {0}]   ;;  %s857_s13 = inlined_call_operand.vmem [shape: f32[1,96], index: 13, kind: input, shape index: {}]   ;;  %s858_s15 = inlined_call_operand.vmem [shape: f32[16,96], index: 15, kind: output, shape index: {1}]  }
   0x1   :  { %v56_v0 = vld [vmem:[%s843_s2 + $0x18] sm:$0xff]  ;;  %v55_v1 = vld [vmem:[%s843_s2 + $0x10] sm:$0xff]  ;;  %v49_v2 = vld [vmem:[%s844_s0] sm:$0xff] }
   0x2   :  { %579 = vmatprep.subr.mxu0 %v56_v0  ;;  %v54_v3 = vld [vmem:[%s843_s2 + $0x8] sm:$0xff]  ;;  %587 = vmatprep.mubr.msk.f32.mxu0 %vm82_vm0, %v49_v2  ;;  %v53_v4 = vld [vmem:[%s843_s2] sm:$0xff]  ;;  %v63_v27 = vld [vmem:[%s847_s6 + $0x18] sm:$0xff] }
   0x3   :  { %580 = vmatpush3.msra.mxu0 %v56_v0  ;;  %v50_v5 = vld [vmem:[%s844_s0 + $0x8] sm:$0xff]  ;;  %v535_v7 = vld [vmem:[%s845_s3] ss:$0 sm:$0xff]  ;;  %v62_v28 = vld [vmem:[%s847_s6 + $0x10] sm:$0xff]  ;;  %590 = vmatprep.subr.mxu1 %v63_v27 }
   0x4   :  { %581 = vmatprep.subr.mxu0 %v55_v1  ;;  %v51_v9 = vld [vmem:[%s846_s1] sm:$0xff]  ;;  %v52_v12 = vld [vmem:[%s846_s1 + $0x8] sm:$0xff]  ;;  %591 = vmatpush3.msra.mxu1 %v63_v27  ;;  %v72_v31 = vld [vmem:[%s848_s8 + $0x38] sm:$0xff] }
   0x5   :  { %582 = vmatpush3.msra.mxu0 %v55_v1  ;;  %v61_v29 = vld [vmem:[%s847_s6 + $0x8] sm:$0xff]  ;;  %592 = vmatprep.subr.mxu1 %v62_v28  ;;  %v60_v30 = vld [vmem:[%s847_s6] sm:$0xff]  ;;  %v71_v32 = vld [vmem:[%s848_s8 + $0x30] sm:$0xff] }
   0x6   :  { %583 = vmatprep.subr.mxu0 %v54_v3  ;;  %593 = vmatpush3.msra.mxu1 %v62_v28  ;;  %v70_v33 = vld [vmem:[%s848_s8 + $0x28] sm:$0xff]  ;;  %v69_v34 = vld [vmem:[%s848_s8 + $0x20] sm:$0xff]  ;;  %v68_v51 = vld [vmem:[%s848_s8 + $0x18] sm:$0xff] }
   0x7   :  { %584 = vmatpush3.msra.mxu0 %v54_v3  ;;  %594 = vmatprep.subr.mxu1 %v61_v29  ;;  %v538_v42 = vld [vmem:[%s849_s4] ss:$0 sm:$0xff]  ;;  %v67_v52 = vld [vmem:[%s848_s8 + $0x10] sm:$0xff]  ;;  %v66_v53 = vld [vmem:[%s848_s8 + $0x8] sm:$0xff] }
   0x8   :  { %585 = vmatprep.subr.mxu0 %v53_v4  ;;  %595 = vmatpush3.msra.mxu1 %v61_v29  ;;  %v539_v44 = vld [vmem:[%s850_s5] ss:$0 sm:$0xff] }
   0x9   :  { %586 = vmatpush3.msra.mxu0 %v53_v4  ;;  %596 = vmatprep.subr.mxu1 %v60_v30  ;;  %v65_v54 = vld [vmem:[%s848_s8] sm:$0xff] }
   0xa   :  { %588 = vmatmul.mubr.msk.f32.vlgmr.msra.gmra.mxu0 %vm82_vm0, %v50_v5  ;;  %597 = vmatpush3.msra.mxu1 %v60_v30  ;;  %v540_v55 = vld [vmem:[%s851_s7] ss:$0 sm:$0xff] }
   0xb   :  { %601 = vmatprep.subr.mxu0 %v72_v31  ;;  %v543_v62 = vld [vmem:[%s852_s9] ss:$0 sm:$0xff] }
   0xc   :  { %602 = vmatpush3.msra.mxu0 %v72_v31  ;;  %v546_v28 = vld [vmem:[%s854_s10] ss:$0 sm:$0xff] }
   0xd   :  { %603 = vmatprep.subr.mxu0 %v71_v32  ;;  %v547_v31 = vld [vmem:[%s855_s11] ss:$0 sm:$0xff] }
   0xe   :  { %604 = vmatpush3.msra.mxu0 %v71_v32 }
   0xf   :  { %605 = vmatprep.subr.mxu0 %v70_v33 }
  0x10   :  { %606 = vmatpush3.msra.mxu0 %v70_v33 }
  0x11   :  { %607 = vmatprep.subr.mxu0 %v69_v34 }
  0x12   :  { %608 = vmatpush3.msra.mxu0 %v69_v34 }
  0x13   :  { %609 = vmatprep.subr.mxu0 %v68_v51 }
  0x14   :  { %610 = vmatpush3.msra.mxu0 %v68_v51 }
  0x15   :  { %611 = vmatprep.subr.mxu0 %v67_v52 }
  0x16   :  { %612 = vmatpush3.msra.mxu0 %v67_v52 }
  0x17   :  { %613 = vmatprep.subr.mxu0 %v66_v53 }
  0x18   :  { %614 = vmatpush3.msra.mxu0 %v66_v53 }
  0x19   :  { %615 = vmatprep.subr.mxu0 %v65_v54 }
  0x1a   :  { %616 = vmatpush3.msra.mxu0 %v65_v54 }
  0xca   :  { %v589_v6 = vpop.f32.mrf.mxu0 }
  0xcb   :  { %v161_v10 = vadd.f32 %v589_v6, %v535_v7 }
  0xcc   :  { %v155_v8 = vpop.f32.mrf.mxu0 }
  0xcd   :  { %v156_v11 = vadd.f32 %v535_v7, %v155_v8  ;;  %v165_v15 = vadd.f32 %v161_v10, %v52_v12 }
  0xcf   :  { %v164_v13 = vadd.f32 %v156_v11, %v51_v9  ;;  %v169_v16 = vsel %vm82_vm0, %v165_v15, 0.0 }
  0xd1   :  { %v166_v14 = vsel %vm82_vm0, %v164_v13, 0.0 }
  0xd2   :  { %167 = vadd.xlane.f32.xlu0 %v166_v14 }
  0xd6   :  { %170 = vadd.xlane.f32.xlu0 %v169_v16 }
 0x15b   :  { %v168_v17 = vpop.xlane.xlu0 %167 }
 0x15c   :  { %v173_v18 = vmul.f32 0.03125, %v168_v17  ;;  %v435_v17 = vld [vmem:[%s853_s12 + $0x18] sm:$0xff] }
 0x15d   :  { %620 = vmatprep.subr.mxu1 %v435_v17 }
 0x15e   :  { %v175_v19 = vsub.f32 %v164_v13, %v173_v18  ;;  %v434_v18 = vld [vmem:[%s853_s12 + $0x10] sm:$0xff] }
 0x15f   :  { %v171_v20 = vpop.xlane.xlu0 %170 }
 0x160   :  { %v174_v21 = vmul.f32 0.03125, %v171_v20  ;;  %v177_v22 = vmul.f32 %v175_v19, %v175_v19  ;;  %v432_v20 = vld [vmem:[%s853_s12] sm:$0xff] }
 0x162   :  { %v176_v23 = vsub.f32 %v165_v15, %v174_v21  ;;  %v179_v24 = vsel %vm82_vm0, %v177_v22, 0.0 }
 0x163   :  { %180 = vadd.xlane.f32.xlu1 %v179_v24 }
 0x164   :  { %v178_v25 = vmul.f32 %v176_v23, %v176_v23 }
 0x166   :  { %v182_v26 = vsel %vm82_vm0, %v178_v25, 0.0 }
 0x167   :  { %183 = vadd.xlane.f32.xlu1 %v182_v26 }
 0x1ec   :  { %v181_v35 = vpop.xlane.xlu1 %180 }
 0x1ed   :  { %v185_v36 = vmul.f32 0.03125, %v181_v35 }
 0x1ef   :  { %v187_v37 = vadd.f32 1e-05, %v185_v36 }
 0x1f0   :  { %v184_v38 = vpop.xlane.xlu1 %183 }
 0x1f1   :  { %631 = vrsqrt.f32 %v187_v37  ;;  %v186_v39 = vmul.f32 0.03125, %v184_v38  ;;  %v548_v37 = vld [vmem:[%s857_s13] ss:$0 sm:$0xff] }
 0x1f3   :  { %v188_v40 = vadd.f32 1e-05, %v186_v39 }
 0x1f5   :  { %633 = vrsqrt.f32 %v188_v40 }
 0x1fe   :  { %v632_v41 = vpop.eup %631 }
 0x1ff   :  { %v191_v43 = vmul.f32 %v632_v41, %v175_v19  ;;  %v433_v19 = vld [vmem:[%s853_s12 + $0x8] sm:$0xff] }
 0x201   :  { %v199_v45 = vmul.f32 %v538_v42, %v191_v43 }
 0x202   :  { %v634_v46 = vpop.eup %633 }
 0x203   :  { %v192_v47 = vmul.f32 %v634_v46, %v176_v23  ;;  %v207_v48 = vadd.f32 %v539_v44, %v199_v45 }
 0x205   :  { %v200_v49 = vmul.f32 %v538_v42, %v192_v47  ;;  %598 = vmatprep.mubr.msk.f32.mxu1 %vm82_vm0, %v207_v48 }
 0x207   :  { %v208_v50 = vadd.f32 %v539_v44, %v200_v49 }
 0x209   :  { %599 = vmatmul.mubr.msk.f32.vlgmr.msra.gmra.mxu1 %vm82_vm0, %v208_v50 }
 0x20a   :  { %621 = vmatpush3.msra.mxu1 %v435_v17 }
 0x20b   :  { %622 = vmatprep.subr.mxu1 %v434_v18 }
 0x20c   :  { %623 = vmatpush3.msra.mxu1 %v434_v18 }
 0x20d   :  { %624 = vmatprep.subr.mxu1 %v433_v19 }
 0x20e   :  { %625 = vmatpush3.msra.mxu1 %v433_v19 }
 0x20f   :  { %626 = vmatprep.subr.mxu1 %v432_v20 }
 0x210   :  { %627 = vmatpush3.msra.mxu1 %v432_v20 }
 0x2c9   :  { %v600_v56 = vpop.f32.mrf.mxu1 }
 0x2ca   :  { %v293_v57 = vadd.f32 %v600_v56, %v540_v55 }
 0x2cb   :  { %v287_v58 = vpop.f32.mrf.mxu1 }
 0x2cc   :  { %v288_v59 = vadd.f32 %v540_v55, %v287_v58  ;;  %v297_v61 = vmax.f32 %v293_v57, 0.0 }
 0x2ce   :  { %v296_v60 = vmax.f32 %v288_v59, 0.0 }
 0x2d0   :  { %617 = vmatprep.mubr.msk.f32.mxu0 %vm304_vm1, %v296_v60 }
 0x2d1   :  { %618 = vmatmul.mubr.msk.f32.vlgmr.msra.gmra.mxu0 %vm304_vm1, %v297_v61 }
 0x391   :  { %v619_v63 = vpop.f32.mrf.mxu0 }
 0x392   :  { %v383_v0 = vadd.f32 %v619_v63, %v543_v62 }
 0x393   :  { %v377_v1 = vpop.f32.mrf.mxu0 }
 0x394   :  { %v378_v2 = vadd.f32 %v543_v62, %v377_v1  ;;  %v387_v3 = vadd.f32 %v383_v0, %v208_v50 }
 0x396   :  { %v391_v4 = vsel %vm82_vm0, %v387_v3, 0.0  ;;  %v386_v5 = vadd.f32 %v378_v2, %v207_v48 }
 0x397   :  { %392 = vadd.xlane.f32.xlu1 %v391_v4 }
 0x398   :  { %v388_v6 = vsel %vm82_vm0, %v386_v5, 0.0 }
 0x399   :  { %389 = vadd.xlane.f32.xlu0 %v388_v6 }
 0x420   :  { %v393_v7 = vpop.xlane.xlu1 %392 }
 0x421   :  { %v395_v8 = vmul.f32 0.03125, %v393_v7 }
 0x422   :  { %v390_v9 = vpop.xlane.xlu0 %389 }
 0x423   :  { %v397_v10 = vsub.f32 %v387_v3, %v395_v8  ;;  %v394_v11 = vmul.f32 0.03125, %v390_v9 }
 0x425   :  { %v396_v12 = vsub.f32 %v386_v5, %v394_v11  ;;  %v399_v13 = vmul.f32 %v397_v10, %v397_v10 }
 0x427   :  { %v403_v14 = vsel %vm82_vm0, %v399_v13, 0.0  ;;  %v398_v15 = vmul.f32 %v396_v12, %v396_v12 }
 0x428   :  { %404 = vadd.xlane.f32.xlu1 %v403_v14 }
 0x429   :  { %v400_v16 = vsel %vm82_vm0, %v398_v15, 0.0 }
 0x42a   :  { %401 = vadd.xlane.f32.xlu0 %v400_v16 }
 0x4b1   :  { %v405_v21 = vpop.xlane.xlu1 %404 }
 0x4b2   :  { %v407_v22 = vmul.f32 0.03125, %v405_v21 }
 0x4b3   :  { %v402_v23 = vpop.xlane.xlu0 %401 }
 0x4b4   :  { %v409_v24 = vadd.f32 1e-05, %v407_v22  ;;  %v406_v25 = vmul.f32 0.03125, %v402_v23 }
 0x4b6   :  { %635 = vrsqrt.f32 %v409_v24  ;;  %v408_v26 = vadd.f32 1e-05, %v406_v25 }
 0x4b8   :  { %637 = vrsqrt.f32 %v408_v26 }
 0x4c3   :  { %v636_v27 = vpop.eup %635 }
 0x4c4   :  { %v413_v29 = vmul.f32 %v636_v27, %v397_v10 }
 0x4c5   :  { %v638_v30 = vpop.eup %637 }
 0x4c6   :  { %v412_v32 = vmul.f32 %v638_v30, %v396_v12  ;;  %v421_v33 = vmul.f32 %v546_v28, %v413_v29 }
 0x4c8   :  { %v420_v34 = vmul.f32 %v546_v28, %v412_v32  ;;  %v429_v35 = vadd.f32 %v547_v31, %v421_v33 }
 0x4ca   :  { %v428_v36 = vadd.f32 %v547_v31, %v420_v34  ;;  %431 = vst.msk [vmem:[%s856_s14 + $0x8] sm:$0xff] %vm82_vm0, %v429_v35 }
 0x4cc   :  { %430 = vst.msk [vmem:[%s856_s14] sm:$0xff] %vm82_vm0, %v428_v36  ;;  %628 = vmatprep.mubr.msk.f32.mxu1 %vm82_vm0, %v428_v36 }
 0x4cd   :  { %629 = vmatmul.mubr.msk.f32.vlgmr.msra.gmra.mxu1 %vm82_vm0, %v429_v35 }
 0x58d   :  { %v630_v38 = vpop.f32.mrf.mxu1 }
 0x58e   :  { %v521_v39 = vadd.f32 %v630_v38, %v548_v37 }
 0x58f   :  { %v515_v40 = vpop.f32.mrf.mxu1 }
 0x590   :  { %526 = vst.msk [vmem:[%s858_s15 + $0x8] sm:$0xff] %vm524_vm2, %v521_v39  ;;  %v516_v41 = vadd.f32 %v548_v37, %v515_v40 }
 0x592   :  { %525 = vst.msk [vmem:[%s858_s15] sm:$0xff] %vm524_vm2, %v516_v41 }

// kernel: transformer_forward.7
= control target key start
LH: loop header
LB: loop body
LE: loop exit
PB: predicated region body
PF: predicated region fallthrough
CT: control target
= control target key end

     0   :  { %vm38_vm0 = vcmask 64512   ;;  %v1501_v0 = vmov 0.0   ;;  %vm1502_vm1 = vmmov 0   ;;  %s1727_s1 = inlined_call_operand.vmem [shape: f32[8,8,8], index: 1, kind: input, shape index: {}]   ;;  %s1728_s0 = inlined_call_operand.vmem [shape: f32[8,8,8], index: 0, kind: input, shape index: {}]   ;;  %s1729_s2 = inlined_call_operand.vmem [shape: f32[8,8,8], index: 2, kind: input, shape index: {}]   ;;  %s1730_s3 = inlined_call_operand.vmem [shape: f32[8,8,8], index: 3, kind: output, shape index: {}]  }
   0x1   :  { %1387 = vmatprep.subr.mxu0 %v1501_v0  ;;  %v22_v1 = vld [vmem:[%s1727_s1] sm:$0xff]  ;;  %1389 = vmatprep.mubr.msk.f32.mxu0 %vm1502_vm1, %v1501_v0  ;;  %v23_v2 = vld [vmem:[%s1727_s1 + $0x8] sm:$0xff]  ;;  %v24_v4 = vld [vmem:[%s1727_s1 + $0x10] sm:$0xff] }
   0x2   :  { %1388 = vmatpush3.xpose.msk.msra.mxu0 %vm38_vm0, %v22_v1  ;;  %1392 = vmatprep.subr.mxu1 %v1501_v0  ;;  %v14_v3 = vld [vmem:[%s1728_s0] sm:$0xff]  ;;  %v15_v5 = vld [vmem:[%s1728_s0 + $0x8] sm:$0xff]  ;;  %v25_v6 = vld [vmem:[%s1727_s1 + $0x18] sm:$0xff] }
   0x3   :  { %1393 = vmatpush3.xpose.msk.msra.mxu1 %vm38_vm0, %v23_v2  ;;  %1397 = vmatprep.subr.mxu0 %v1501_v0  ;;  %v16_v7 = vld [vmem:[%s1728_s0 + $0x10] sm:$0xff]  ;;  %v26_v8 = vld [vmem:[%s1727_s1 + $0x20] sm:$0xff]  ;;  %v17_v9 = vld [vmem:[%s1728_s0 + $0x18] sm:$0xff] }
   0x4   :  { %1394 = vmatprep.mubr.msk.f32.mxu1 %vm1502_vm1, %v1501_v0  ;;  %1402 = vmatprep.subr.mxu1 %v1501_v0  ;;  %v27_v10 = vld [vmem:[%s1727_s1 + $0x28] sm:$0xff]  ;;  %v18_v11 = vld [vmem:[%s1728_s0 + $0x20] sm:$0xff]  ;;  %v28_v12 = vld [vmem:[%s1727_s1 + $0x30] sm:$0xff] }
   0x5   :  { %1390 = vmatmul.mubr.msk.f32.vlgmr.msra.gmra.mxu0 %vm38_vm0, %v14_v3  ;;  %v19_v13 = vld [vmem:[%s1728_s0 + $0x28] sm:$0xff]  ;;  %v29_v14 = vld [vmem:[%s1727_s1 + $0x38] sm:$0xff]  ;;  %v20_v15 = vld [vmem:[%s1728_s0 + $0x30] sm:$0xff] }
   0x6   :  { %1398 = vmatpush3.xpose.msk.msra.mxu0 %vm38_vm0, %v24_v4  ;;  %1395 = vmatmul.mubr.msk.f32.vlgmr.msra.gmra.mxu1 %vm38_vm0, %v15_v5  ;;  %v21_v16 = vld [vmem:[%s1728_s0 + $0x38] sm:$0xff] }
   0x7   :  { %1399 = vmatprep.mubr.msk.f32.mxu0 %vm1502_vm1, %v1501_v0  ;;  %1403 = vmatpush3.xpose.msk.msra.mxu1 %vm38_vm0, %v25_v6 }
   0x8   :  { %1407 = vmatprep.subr.mxu0 %v1501_v0  ;;  %1404 = vmatprep.mubr.msk.f32.mxu1 %vm1502_vm1, %v1501_v0 }
   0x9   :  { %1400 = vmatmul.mubr.msk.f32.vlgmr.msra.gmra.mxu0 %vm38_vm0, %v16_v7  ;;  %1412 = vmatprep.subr.mxu1 %v1501_v0 }
   0xa   :  { %1408 = vmatpush3.xpose.msk.msra.mxu0 %vm38_vm0, %v26_v8  ;;  %1405 = vmatmul.mubr.msk.f32.vlgmr.msra.gmra.mxu1 %vm38_vm0, %v17_v9 }
   0xb   :  { %1409 = vmatprep.mubr.msk.f32.mxu0 %vm1502_vm1, %v1501_v0  ;;  %1413 = vmatpush3.xpose.msk.msra.mxu1 %vm38_vm0, %v27_v10 }
   0xc   :  { %1417 = vmatprep.subr.mxu0 %v1501_v0  ;;  %1414 = vmatprep.mubr.msk.f32.mxu1 %vm1502_vm1, %v1501_v0 }
   0xd   :  { %1410 = vmatmul.mubr.msk.f32.vlgmr.msra.gmra.mxu0 %vm38_vm0, %v18_v11  ;;  %1422 = vmatprep.subr.mxu1 %v1501_v0 }
   0xe   :  { %1418 = vmatpush3.xpose.msk.msra.mxu0 %vm38_vm0, %v28_v12  ;;  %1415 = vmatmul.mubr.msk.f32.vlgmr.msra.gmra.mxu1 %vm38_vm0, %v19_v13 }
   0xf   :  { %1419 = vmatprep.mubr.msk.f32.mxu0 %vm1502_vm1, %v1501_v0  ;;  %1423 = vmatpush3.xpose.msk.msra.mxu1 %vm38_vm0, %v29_v14 }
  0x10   :  { %1424 = vmatprep.mubr.msk.f32.mxu1 %vm1502_vm1, %v1501_v0  ;;  %1427 = vmatprep.subr.mxu0 %v1501_v0 }
  0x11   :  { %1420 = vmatmul.mubr.msk.f32.vlgmr.msra.gmra.mxu0 %vm38_vm0, %v20_v15  ;;  %1432 = vmatprep.subr.mxu1 %v1501_v0 }
  0x12   :  { %1425 = vmatmul.mubr.msk.f32.vlgmr.msra.gmra.mxu1 %vm38_vm0, %v21_v16  ;;  %1429 = vmatprep.mubr.msk.f32.mxu0 %vm1502_vm1, %v1501_v0 }
  0x13   :  { %1434 = vmatprep.mubr.msk.f32.mxu1 %vm1502_vm1, %v1501_v0 }
  0xc5   :  { %v111_v17 = vpop.f32.mrf.mxu0 }
  0xc6   :  { %v647_v18 = vsel %vm38_vm0, %v111_v17, -inf  ;;  %v187_v19 = vpop.f32.mrf.mxu1 }
  0xc7   :  { %648 = vmax.xlane.f32.xlu0 %v647_v18  ;;  %v1391_v20 = vpop.f32.mrf.mxu0  ;;  %v650_v22 = vsel %vm38_vm0, %v187_v19, -inf  ;;  %v30_v18 = vld [vmem:[%s1729_s2] sm:$0xff] }
  0xc8   :  { %v1396_v21 = vpop.f32.mrf.mxu1  ;;  %1428 = vmatpush3.msra.mxu0 %v30_v18 }
  0xc9   :  { %v263_v23 = vpop.f32.mrf.mxu0  ;;  %1437 = vmatprep.subr.mxu0 %v1501_v0 }
  0xca   :  { %v653_v24 = vsel %vm38_vm0, %v263_v23, -inf  ;;  %v339_v25 = vpop.f32.mrf.mxu1 }
  0xcb   :  { %651 = vmax.xlane.f32.xlu0 %v650_v22  ;;  %654 = vmax.xlane.f32.xlu1 %v653_v24  ;;  %v1401_v26 = vpop.f32.mrf.mxu0  ;;  %v656_v28 = vsel %vm38_vm0, %v339_v25, -inf }
  0xcc   :  { %v1406_v27 = vpop.f32.mrf.mxu1 }
  0xcd   :  { %v415_v29 = vpop.f32.mrf.mxu0 }
  0xce   :  { %v659_v30 = vsel %vm38_vm0, %v415_v29, -inf  ;;  %v491_v31 = vpop.f32.mrf.mxu1 }
  0xcf   :  { %657 = vmax.xlane.f32.xlu1 %v656_v28  ;;  %660 = vmax.xlane.f32.xlu0 %v659_v30  ;;  %v1411_v32 = vpop.f32.mrf.mxu0  ;;  %v662_v34 = vsel %vm38_vm0, %v491_v31, -inf }
  0xd0   :  { %v1416_v33 = vpop.f32.mrf.mxu1 }
  0xd1   :  { %v567_v35 = vpop.f32.mrf.mxu0 }
  0xd2   :  { %v665_v36 = vsel %vm38_vm0, %v567_v35, -inf  ;;  %v643_v37 = vpop.f32.mrf.mxu1 }
  0xd3   :  { %663 = vmax.xlane.f32.xlu1 %v662_v34  ;;  %666 = vmax.xlane.f32.xlu0 %v665_v36  ;;  %v1421_v38 = vpop.f32.mrf.mxu0  ;;  %v668_v40 = vsel %vm38_vm0, %v643_v37, -inf  ;;  %v33_v34 = vld [vmem:[%s1729_s2 + $0x18] sm:$0xff]  ;;  %v34_v36 = vld [vmem:[%s1729_s2 + $0x20] sm:$0xff] }
  0xd4   :  { %v1426_v39 = vpop.f32.mrf.mxu1 }
  0xd7   :  { %669 = vmax.xlane.f32.xlu1 %v668_v40  ;;  %v35_v40 = vld [vmem:[%s1729_s2 + $0x28] sm:$0xff] }
 0x150   :  { %v649_v41 = vpop.xlane.xlu0 %648 }
 0x151   :  { %v671_v42 = vsub.f32 %v111_v17, %v649_v41 }
 0x153   :  { %v679_v43 = vmul.f32 1.442695, %v671_v42  ;;  %v36_v42 = vld [vmem:[%s1729_s2 + $0x30] sm:$0xff] }
 0x154   :  { %v652_v44 = vpop.xlane.xlu0 %651  ;;  %v655_v45 = vpop.xlane.xlu1 %654 }
 0x155   :  { %1469 = vpow2.f32 %v679_v43  ;;  %v672_v46 = vsub.f32 %v187_v19, %v652_v44  ;;  %v673_v47 = vsub.f32 %v263_v23, %v655_v45  ;;  %v31_v19 = vld [vmem:[%s1729_s2 + $0x8] sm:$0xff] }
 0x156   :  { %1433 = vmatpush3.msra.mxu1 %v31_v19 }
 0x157   :  { %v681_v48 = vmul.f32 1.442695, %v672_v46  ;;  %v683_v49 = vmul.f32 1.442695, %v673_v47  ;;  %1442 = vmatprep.subr.mxu1 %v1501_v0  ;;  %v37_v46 = vld [vmem:[%s1729_s2 + $0x38] sm:$0xff] }
 0x158   :  { %v658_v50 = vpop.xlane.xlu1 %657  ;;  %v661_v51 = vpop.xlane.xlu0 %660 }
 0x159   :  { %1471 = vpow2.f32 %v681_v48  ;;  %v674_v52 = vsub.f32 %v339_v25, %v658_v50  ;;  %v675_v53 = vsub.f32 %v415_v29, %v661_v51  ;;  %v32_v29 = vld [vmem:[%s1729_s2 + $0x10] sm:$0xff] }
 0x15a   :  { %1473 = vpow2.f32 %v683_v49 }
 0x15b   :  { %v685_v54 = vmul.f32 1.442695, %v674_v52  ;;  %v687_v55 = vmul.f32 1.442695, %v675_v53 }
 0x15c   :  { %v664_v56 = vpop.xlane.xlu1 %663  ;;  %v667_v57 = vpop.xlane.xlu0 %666 }
 0x15d   :  { %1475 = vpow2.f32 %v685_v54  ;;  %v676_v58 = vsub.f32 %v491_v31, %v664_v56  ;;  %v677_v59 = vsub.f32 %v567_v35, %v667_v57 }
 0x15e   :  { %1477 = vpow2.f32 %v687_v55 }
 0x15f   :  { %v689_v60 = vmul.f32 1.442695, %v676_v58  ;;  %v691_v61 = vmul.f32 1.442695, %v677_v59 }
 0x160   :  { %v670_v62 = vpop.xlane.xlu1 %669 }
 0x161   :  { %1479 = vpow2.f32 %v689_v60  ;;  %v678_v63 = vsub.f32 %v643_v37, %v670_v62 }
 0x162   :  { %v1470_v1 = vpop.eup %1469  ;;  %1481 = vpow2.f32 %v691_v61 }
 0x163   :  { %v693_v2 = vmul.f32 1.442695, %v678_v63  ;;  %v695_v3 = vsel %vm38_vm0, %v1470_v1, 0.0 }
 0x164   :  { %696 = vadd.xlane.f32.xlu0 %v695_v3 }
 0x165   :  { %1483 = vpow2.f32 %v693_v2 }
 0x166   :  { %v1472_v4 = vpop.eup %1471 }
 0x167   :  { %v1474_v5 = vpop.eup %1473  ;;  %v698_v6 = vsel %vm38_vm0, %v1472_v4, 0.0 }
 0x168   :  { %699 = vadd.xlane.f32.xlu1 %v698_v6  ;;  %v701_v7 = vsel %vm38_vm0, %v1474_v5, 0.0 }
 0x169   :  { %702 = vadd.xlane.f32.xlu0 %v701_v7 }
 0x16a   :  { %v1476_v8 = vpop.eup %1475 }
 0x16b   :  { %v1478_v9 = vpop.eup %1477  ;;  %v704_v10 = vsel %vm38_vm0, %v1476_v8, 0.0 }
 0x16c   :  { %705 = vadd.xlane.f32.xlu1 %v704_v10  ;;  %v707_v11 = vsel %vm38_vm0, %v1478_v9, 0.0 }
 0x16d   :  { %708 = vadd.xlane.f32.xlu0 %v707_v11 }
 0x16e   :  { %v1630_v12 = vpop.eup %1479 }
 0x16f   :  { %v1632_v13 = vpop.eup %1481  ;;  %v710_v14 = vsel %vm38_vm0, %v1630_v12, 0.0 }
 0x170   :  { %711 = vadd.xlane.f32.xlu1 %v710_v14  ;;  %v713_v15 = vsel %vm38_vm0, %v1632_v13, 0.0 }
 0x171   :  { %714 = vadd.xlane.f32.xlu0 %v713_v15 }
 0x172   :  { %v1638_v16 = vpop.eup %1483 }
 0x173   :  { %v716_v17 = vsel %vm38_vm0, %v1638_v16, 0.0 }
 0x174   :  { %717 = vadd.xlane.f32.xlu1 %v716_v17 }
 0x1ed   :  { %v697_v20 = vpop.xlane.xlu0 %696 }
 0x1ee   :  { %1485 = vrcp.f32 %v697_v20 }
 0x1f1   :  { %v700_v21 = vpop.xlane.xlu1 %699 }
 0x1f2   :  { %1487 = vrcp.f32 %v700_v21  ;;  %v703_v22 = vpop.xlane.xlu0 %702 }
 0x1f3   :  { %1489 = vrcp.f32 %v703_v22 }
 0x1f5   :  { %v706_v23 = vpop.xlane.xlu1 %705 }
 0x1f6   :  { %1491 = vrcp.f32 %v706_v23  ;;  %v709_v24 = vpop.xlane.xlu0 %708 }
 0x1f7   :  { %1493 = vrcp.f32 %v709_v24 }
 0x1f9   :  { %v712_v25 = vpop.xlane.xlu1 %711 }
 0x1fa   :  { %1495 = vrcp.f32 %v712_v25  ;;  %v715_v26 = vpop.xlane.xlu0 %714 }
 0x1fb   :  { %v1486_v27 = vpop.eup %1485  ;;  %1497 = vrcp.f32 %v715_v26 }
 0x1fc   :  { %v720_v28 = vmul.f32 %v1486_v27, %v1470_v1 }
 0x1fd   :  { %v718_v30 = vpop.xlane.xlu1 %717 }
 0x1fe   :  { %1499 = vrcp.f32 %v718_v30  ;;  %1430 = vmatmul.mubr.msk.f32.vlgmr.msra.gmra.mxu0 %vm38_vm0, %v720_v28 }
 0x1ff   :  { %v1488_v31 = vpop.eup %1487  ;;  %1438 = vmatpush3.msra.mxu0 %v32_v29  ;;  %1439 = vmatprep.mubr.msk.f32.mxu0 %vm1502_vm1, %v1501_v0 }
 0x200   :  { %v1490_v32 = vpop.eup %1489  ;;  %v722_v33 = vmul.f32 %v1488_v31, %v1472_v4  ;;  %1447 = vmatprep.subr.mxu0 %v1501_v0 }
 0x201   :  { %v724_v35 = vmul.f32 %v1490_v32, %v1474_v5 }
 0x202   :  { %1435 = vmatmul.mubr.msk.f32.vlgmr.msra.gmra.mxu1 %vm38_vm0, %v722_v33 }
 0x203   :  { %v1492_v37 = vpop.eup %1491  ;;  %1440 = vmatmul.mubr.msk.f32.vlgmr.msra.gmra.mxu0 %vm38_vm0, %v724_v35  ;;  %1443 = vmatpush3.msra.mxu1 %v33_v34 }
 0x204   :  { %v1494_v38 = vpop.eup %1493  ;;  %1444 = vmatprep.mubr.msk.f32.mxu1 %vm1502_vm1, %v1501_v0  ;;  %1448 = vmatpush3.msra.mxu0 %v34_v36  ;;  %v726_v39 = vmul.f32 %v1492_v37, %v1476_v8 }
 0x205   :  { %1449 = vmatprep.mubr.msk.f32.mxu0 %vm1502_vm1, %v1501_v0  ;;  %v728_v41 = vmul.f32 %v1494_v38, %v1478_v9  ;;  %1452 = vmatprep.subr.mxu1 %v1501_v0 }
 0x206   :  { %1445 = vmatmul.mubr.msk.f32.vlgmr.msra.gmra.mxu1 %vm38_vm0, %v726_v39  ;;  %1457 = vmatprep.subr.mxu0 %v1501_v0 }
 0x207   :  { %v1496_v43 = vpop.eup %1495  ;;  %1450 = vmatmul.mubr.msk.f32.vlgmr.msra.gmra.mxu0 %vm38_vm0, %v728_v41  ;;  %1453 = vmatpush3.msra.mxu1 %v35_v40 }
 0x208   :  { %v1498_v44 = vpop.eup %1497  ;;  %1454 = vmatprep.mubr.msk.f32.mxu1 %vm1502_vm1, %v1501_v0  ;;  %1458 = vmatpush3.msra.mxu0 %v36_v42  ;;  %v730_v45 = vmul.f32 %v1496_v43, %v1630_v12 }
 0x209   :  { %1459 = vmatprep.mubr.msk.f32.mxu0 %vm1502_vm1, %v1501_v0  ;;  %v732_v47 = vmul.f32 %v1498_v44, %v1632_v13  ;;  %1462 = vmatprep.subr.mxu1 %v1501_v0 }
 0x20a   :  { %1455 = vmatmul.mubr.msk.f32.vlgmr.msra.gmra.mxu1 %vm38_vm0, %v730_v45 }
 0x20b   :  { %v1500_v48 = vpop.eup %1499  ;;  %1460 = vmatmul.mubr.msk.f32.vlgmr.msra.gmra.mxu0 %vm38_vm0, %v732_v47  ;;  %1463 = vmatpush3.msra.mxu1 %v37_v46 }
 0x20c   :  { %1464 = vmatprep.mubr.msk.f32.mxu1 %vm1502_vm1, %v1501_v0  ;;  %v734_v49 = vmul.f32 %v1500_v48, %v1638_v16 }
 0x20e   :  { %1465 = vmatmul.mubr.msk.f32.vlgmr.msra.gmra.mxu1 %vm38_vm0, %v734_v49 }
 0x2be   :  { %v804_v50 = vpop.f32.mrf.mxu0 }
 0x2bf   :  { %1319 = vst.msk [vmem:[%s1730_s3] sm:$0xff] %vm38_vm0, %v804_v50 }
 0x2c0   :  { %v1431_v51 = vpop.f32.mrf.mxu0 }
 0x2c2   :  { %v877_v52 = vpop.f32.mrf.mxu1 }
 0x2c3   :  { %1320 = vst.msk [vmem:[%s1730_s3 + $0x8] sm:$0xff] %vm38_vm0, %v877_v52  ;;  %v950_v53 = vpop.f32.mrf.mxu0 }
 0x2c4   :  { %1321 = vst.msk [vmem:[%s1730_s3 + $0x10] sm:$0xff] %vm38_vm0, %v950_v53  ;;  %v1436_v0 = vpop.f32.mrf.mxu1 }
 0x2c5   :  { %v1441_v54 = vpop.f32.mrf.mxu0 }
 0x2c6   :  { %v1023_v55 = vpop.f32.mrf.mxu1 }
 0x2c7   :  { %1322 = vst.msk [vmem:[%s1730_s3 + $0x18] sm:$0xff] %vm38_vm0, %v1023_v55  ;;  %v1096_v56 = vpop.f32.mrf.mxu0 }
 0x2c8   :  { %1323 = vst.msk [vmem:[%s1730_s3 + $0x20] sm:$0xff] %vm38_vm0, %v1096_v56  ;;  %v1446_v57 = vpop.f32.mrf.mxu1 }
 0x2c9   :  { %v1451_v58 = vpop.f32.mrf.mxu0 }
 0x2ca   :  { %v1169_v59 = vpop.f32.mrf.mxu1 }
 0x2cb   :  { %1324 = vst.msk [vmem:[%s1730_s3 + $0x28] sm:$0xff] %vm38_vm0, %v1169_v59  ;;  %v1242_v60 = vpop.f32.mrf.mxu0 }
 0x2cc   :  { %1325 = vst.msk [vmem:[%s1730_s3 + $0x30] sm:$0xff] %vm38_vm0, %v1242_v60  ;;  %v1456_v61 = vpop.f32.mrf.mxu1 }
 0x2cd   :  { %v1461_v62 = vpop.f32.mrf.mxu0 }
 0x2ce   :  { %v1315_v63 = vpop.f32.mrf.mxu1 }
 0x2cf   :  { %1326 = vst.msk [vmem:[%s1730_s3 + $0x38] sm:$0xff] %vm38_vm0, %v1315_v63 }
 0x2d0   :  { %v1466_v1 = vpop.f32.mrf.mxu1 }

// kernel: transformer_forward.11
= control target key start
LH: loop header
LB: loop body
LE: loop exit
PB: predicated region body
PF: predicated region fallthrough
CT: control target
= control target key end

     0   :  { %v339_v4 = vmov 0.0   ;;  %s513_s0 = inlined_call_operand.vmem [shape: f32[2,256], index: 0, kind: input, shape index: {}]   ;;  %s514_s1 = inlined_call_operand.vmem [shape: f32[256,64], index: 1, kind: input, shape index: {}]   ;;  %s515_s2 = inlined_call_operand.vmem [shape: f32[1,64], index: 2, kind: input, shape index: {}]   ;;  %s516_s3 = inlined_call_operand.vmem [shape: f32[64,128], index: 3, kind: input, shape index: {}]   ;;  %s517_s4 = inlined_call_operand.vmem [shape: f32[1,128], index: 4, kind: input, shape index: {}]   ;;  %s518_s5 = inlined_call_operand.hbm [shape: f32[2,128], index: 5, kind: output, shape index: {}]  }
   0x1   :  { %v53_v0 = vld [vmem:[%s514_s1 + $0xf8] sm:$0xff]  ;;  %v52_v2 = vld [vmem:[%s514_s1 + $0xf0] sm:$0xff]  ;;  %295 = vmatprep.subr.mxu1 %v339_v4  ;;  %v51_v5 = vld [vmem:[%s514_s1 + $0xe8] sm:$0xff] }
   0x2   :  { %v37_v1 = vld [vmem:[%s514_s1 + $0x78] sm:$0xff]  ;;  %251 = vmatprep.subr.mxu0 %v53_v0  ;;  %v36_v3 = vld [vmem:[%s514_s1 + $0x70] sm:$0xff]  ;;  %v35_v6 = vld [vmem:[%s514_s1 + $0x68] sm:$0xff] }
   0x3   :  { %252 = vmatpush3.msra.mxu0 %v37_v1  ;;  %v50_v7 = vld [vmem:[%s514_s1 + $0xe0] sm:$0xff]  ;;  %v49_v9 = vld [vmem:[%s514_s1 + $0xd8] sm:$0xff]  ;;  %v48_v11 = vld [vmem:[%s514_s1 + $0xd0] sm:$0xff] }
   0x4   :  { %253 = vmatprep.subr.mxu0 %v52_v2  ;;  %v34_v8 = vld [vmem:[%s514_s1 + $0x60] sm:$0xff]  ;;  %v33_v10 = vld [vmem:[%s514_s1 + $0x58] sm:$0xff]  ;;  %v32_v12 = vld [vmem:[%s514_s1 + $0x50] sm:$0xff] }
   0x5   :  { %254 = vmatpush3.msra.mxu0 %v36_v3  ;;  %v47_v13 = vld [vmem:[%s514_s1 + $0xc8] sm:$0xff]  ;;  %v248_v14 = vld.sshfl [vmem:[%s513_s0] sm:$0x33 pattern:$0x76325410]  ;;  %v150_v17 = vld [vmem:[%s516_s3 + $0x38] sm:$0xff] }
   0x6   :  { %255 = vmatprep.subr.mxu0 %v51_v5  ;;  %v31_v15 = vld [vmem:[%s514_s1 + $0x48] sm:$0xff]  ;;  %v69_v16 = vcombine.high %v248_v14, %v248_v14  ;;  %v46_v18 = vld [vmem:[%s514_s1 + $0xc0] sm:$0xff]  ;;  %296 = vmatpush3.msra.mxu1 %v150_v17  ;;  %v149_v19 = vld [vmem:[%s516_s3 + $0x30] sm:$0xff] }
   0x7   :  { %256 = vmatpush3.msra.mxu0 %v35_v6 }
   0x8   :  { %257 = vmatprep.subr.mxu0 %v50_v7 }
   0x9   :  { %258 = vmatpush3.msra.mxu0 %v34_v8 }
   0xa   :  { %259 = vmatprep.subr.mxu0 %v49_v9 }
   0xb   :  { %260 = vmatpush3.msra.mxu0 %v33_v10 }
   0xc   :  { %261 = vmatprep.subr.mxu0 %v48_v11 }
   0xd   :  { %262 = vmatpush3.msra.mxu0 %v32_v12 }
   0xe   :  { %10 = vsyncpa [#allocation3], 0  ;;  %263 = vmatprep.subr.mxu0 %v47_v13  ;;  %v30_v20 = vld [vmem:[%s514_s1 + $0x40] sm:$0xff]  ;;  %136 = vmatprep.mubr.f32.mxu0 %v69_v16  ;;  %v45_v21 = vld [vmem:[%s514_s1 + $0xb8] sm:$0xff]  ;;  %vm340_vm0 = vmmov 0   ;;  %vm158_vm1 = vcmask 523264  }
   0xf   :  { %264 = vmatpush3.msra.mxu0 %v31_v15  ;;  %297 = vmatprep.subr.mxu1 %v339_v4  ;;  %v148_v22 = vld [vmem:[%s516_s3 + $0x28] sm:$0xff]  ;;  %v29_v23 = vld [vmem:[%s514_s1 + $0x38] sm:$0xff]  ;;  %v44_v24 = vld [vmem:[%s514_s1 + $0xb0] sm:$0xff] }
  0x10   :  { %265 = vmatprep.subr.mxu0 %v46_v18  ;;  %298 = vmatpush3.msra.mxu1 %v149_v19  ;;  %v28_v25 = vld [vmem:[%s514_s1 + $0x30] sm:$0xff]  ;;  %v43_v26 = vld [vmem:[%s514_s1 + $0xa8] sm:$0xff]  ;;  %v42_v28 = vld [vmem:[%s514_s1 + $0xa0] sm:$0xff] }
  0x11   :  { %266 = vmatpush3.msra.mxu0 %v30_v20  ;;  %299 = vmatprep.subr.mxu1 %v339_v4  ;;  %v27_v27 = vld [vmem:[%s514_s1 + $0x28] sm:$0xff]  ;;  %v26_v29 = vld [vmem:[%s514_s1 + $0x20] sm:$0xff]  ;;  %v41_v30 = vld [vmem:[%s514_s1 + $0x98] sm:$0xff] }
  0x12   :  { %267 = vmatprep.subr.mxu0 %v45_v21  ;;  %300 = vmatpush3.msra.mxu1 %v148_v22  ;;  %v25_v31 = vld [vmem:[%s514_s1 + $0x18] sm:$0xff]  ;;  %v40_v32 = vld [vmem:[%s514_s1 + $0x90] sm:$0xff]  ;;  %v39_v34 = vld [vmem:[%s514_s1 + $0x88] sm:$0xff] }
  0x13   :  { %268 = vmatpush3.msra.mxu0 %v29_v23  ;;  %301 = vmatprep.subr.mxu1 %v339_v4  ;;  %v24_v33 = vld [vmem:[%s514_s1 + $0x10] sm:$0xff]  ;;  %v23_v35 = vld [vmem:[%s514_s1 + $0x8] sm:$0xff]  ;;  %v38_v36 = vld [vmem:[%s514_s1 + $0x80] sm:$0xff] }
  0x14   :  { %269 = vmatprep.subr.mxu0 %v44_v24  ;;  %v22_v37 = vld [vmem:[%s514_s1] sm:$0xff]  ;;  %v146_v39 = vld [vmem:[%s516_s3 + $0x18] sm:$0xff]  ;;  %v145_v40 = vld [vmem:[%s516_s3 + $0x10] sm:$0xff]  ;;  %311 = vmatprep.mubr.msk.f32.mxu1 %vm340_vm0, %v339_v4 }
  0x15   :  { %270 = vmatpush3.msra.mxu0 %v28_v25  ;;  %v147_v38 = vld [vmem:[%s516_s3 + $0x20] sm:$0xff]  ;;  %v144_v41 = vld [vmem:[%s516_s3 + $0x8] sm:$0xff] }
  0x16   :  { %271 = vmatprep.subr.mxu0 %v43_v26  ;;  %302 = vmatpush3.msra.mxu1 %v147_v38  ;;  %v143_v42 = vld [vmem:[%s516_s3] sm:$0xff]  ;;  %s341_s3 = smov [#allocation2]  }
  0x17   :  { %272 = vmatpush3.msra.mxu0 %v27_v27  ;;  %303 = vmatprep.subr.mxu1 %v339_v4  ;;  %v247_v44 = vld [vmem:[%s515_s2] ss:$0 sm:$0xff]  ;;  %s239_s26 = sshll.u32 %s341_s3, 4  ;;  %s240_s26 = int_to_ptr.vmem [resolvable:$true] %s239_s26 }
  0x18   :  { %273 = vmatprep.subr.mxu0 %v42_v28  ;;  %304 = vmatpush3.msra.mxu1 %v146_v39  ;;  %v249_v49 = vld [vmem:[%s517_s4] ss:$0 sm:$0xff]  ;;  %s317_s27 = scalar_lea.vmem %s240_s26, 32  ;;  %p322_p1 = scmp.lt.s32.totalorder %s240_s26, %s240_s26 }
  0x19   :  { %274 = vmatpush3.msra.mxu0 %v26_v29  ;;  %305 = vmatprep.subr.mxu1 %v339_v4  ;;  %p318_p0 = scmp.ne.s32.totalorder %s240_s26, %s317_s27  ;;  %p323_p2 = scmp.lt.s32.totalorder %s317_s27, %s317_s27 }
  0x1a   :  { %275 = vmatprep.subr.mxu0 %v41_v30  ;;  %306 = vmatpush3.msra.mxu1 %v145_v40 }
  0x1b   :  { %276 = vmatpush3.msra.mxu0 %v25_v31  ;;  %307 = vmatprep.subr.mxu1 %v339_v4  ;;  %p324_p3 = por %p323_p2, %p322_p1 }
  0x1c   :  { %277 = vmatprep.subr.mxu0 %v40_v32  ;;  %308 = vmatpush3.msra.mxu1 %v144_v41 }
  0x1d   :  { %278 = vmatpush3.msra.mxu0 %v24_v33  ;;  %309 = vmatprep.subr.mxu1 %v339_v4  ;;  %p325_p4 = pnand %p324_p3, %p318_p0 }
  0x1e   :  { %279 = vmatprep.subr.mxu0 %v39_v34  ;;  %310 = vmatpush3.msra.mxu1 %v143_v42 }
  0x1f   :  { %280 = vmatpush3.msra.mxu0 %v23_v35 }
  0x20   :  { %281 = vmatprep.subr.mxu0 %v38_v36 }
  0x21   :  { %282 = vmatpush3.msra.mxu0 %v22_v37 }
  0x22   :  { %137 = vmatmul.mubr.f32.vlgmr.msra.gmra.mxu0 %v248_v14 }
  0xe2   :  { %v283_v43 = vpop.f32.mrf.mxu0 }
  0xe4   :  { %v284_v45 = vpop.f32.mrf.mxu0 }
  0xe5   :  { %v285_v46 = vadd.f32 %v284_v45, %v283_v43 }
  0xe7   :  { %v139_v47 = vadd.f32 %v285_v46, %v247_v44 }
  0xe9   :  { %v142_v48 = vmax.f32 %v139_v47, 0.0 }
  0xeb   :  { %312 = vmatmul.mubr.msk.f32.vlgmr.msra.gmra.mxu1 %vm158_vm1, %v142_v48 }
 0x1ab   :  { %v228_v50 = vpop.f32.mrf.mxu1 }
 0x1ac   :  { %v229_v51 = vadd.f32 %v249_v49, %v228_v50 }
 0x1ad   :  { %v313_v52 = vpop.f32.mrf.mxu1 }
 0x1ae   :  { %232 = vst [vmem:[#allocation2] sm:$0x3] %v229_v51 }
 0x1af   :  { %328 = shalt.err (!%p325_p4)
}
 0x1b0   :  { %242 = dma.vmem_to_hbm [thread:$0]  %s240_s26, 32, %s518_s5, [#allocation3]  }
 0x1b1   :  { %337 = dma.done.wait [#allocation3], 32  }
 0x1b2   :  { %338 = vsyncadd [#allocation3], 4294967264 }
 0x1b3   :  { %246 = vsyncpa [#allocation3], 1 }

</bundles_post_ra>
